<compile_context>
chip_gen: v6e
topology: v6e:2x2x1
jax: 0.10.0
libtpu: 0.0.40
codegen_flags: <defaults>
</compile_context>

<pallas_src>
import functools

import jax
import jax.numpy as jnp
from jax.experimental import pallas as pl
from jax.experimental.pallas import tpu as pltpu

IN_DIM = 32 * 32 * 3          # 3072
LATENT_DIM = 3
LATENT_PAD = 128              # lane-dense latent slab width
ENC_DIMS = [(IN_DIM, 128), (128, 64), (64, 12), (12, LATENT_DIM)]
DEC_DIMS = [(LATENT_DIM, 12), (12, 64), (64, 128), (128, IN_DIM)]
_VMEM_LIMIT = 48 * 1024 * 1024


def _round_up(n, m):
    return ((n + m - 1) // m) * m


def _fcn_ae_kernel(x_ref,
                   ew0, eb0, ew1, eb1, ew2, eb2, ew3, eb3,
                   dw0, db0, dw1, db1, dw2, db2, dw3, db3,
                   x2_ref, x1_ref):
    """Full encoder+decoder chain for one batch tile, resident in VMEM."""

    def lin(h, w_ref, b_ref):
        # MXU matmul with f32 accumulation + bias broadcast on the VPU.
        return jnp.dot(h, w_ref[...], preferred_element_type=jnp.float32) + b_ref[...]

    x = x_ref[...]

    # ---- encoder ----
    # Big (3072 x 128) layer: bf16 operands, f32 accumulation.
    h = jnp.maximum(lin(x.astype(jnp.bfloat16), ew0, eb0), 0.0)
    h = jnp.maximum(lin(h, ew1, eb1), 0.0)
    h = jnp.maximum(lin(h, ew2, eb2), 0.0)
    # ew3/eb3 are zero-padded to 128 output lanes, so z[:, 3:] == 0 and the
    # store below is lane-dense (no masked partial stores).
    z = lin(h, ew3, eb3)                          # (tb, 128) latent slab
    x1_ref[...] = z.astype(x1_ref.dtype)

    # ---- decoder ----
    # dw0 is zero-padded along its input dim, so z @ dw0 == z[:, :3] @ dw0_real.
    h = jnp.maximum(lin(z, dw0, db0), 0.0)
    h = jnp.maximum(lin(h, dw1, db1), 0.0)
    h = jnp.maximum(lin(h, dw2, db2), 0.0)
    # Big (128 x 3072) layer: bf16 operands, f32 accumulation.
    o = jnp.tanh(lin(h.astype(jnp.bfloat16), dw3, db3))
    x2_ref[...] = o.astype(x2_ref.dtype)


def _prepare_params(params):
    """bf16 for the two big weights; zero-pad the 3-wide latent to 128 lanes."""
    (ew0, eb0), (ew1, eb1), (ew2, eb2), (ew3, eb3) = params[:4]
    (dw0, db0), (dw1, db1), (dw2, db2), (dw3, db3) = params[4:]
    ew0 = ew0.astype(jnp.bfloat16)
    dw3 = dw3.astype(jnp.bfloat16)
    pad = LATENT_PAD - LATENT_DIM
    ew3 = jnp.pad(ew3, ((0, 0), (0, pad)))
    eb3 = jnp.pad(eb3, ((0, 0), (0, pad)))
    dw0 = jnp.pad(dw0, ((0, pad), (0, 0)))
    return [ew0, eb0, ew1, eb1, ew2, eb2, ew3, eb3,
            dw0, db0, dw1, db1, dw2, db2, dw3, db3]


@functools.partial(jax.jit, static_argnames=("batch_tile",))
def fcn_autoencoder_forward(x, params, *, batch_tile=256):
    """Returns (x2, x1) matching the PyTorch module's forward()."""
    B, D = x.shape
    assert D == IN_DIM

    # Batch tile: multiple of 8, no larger than needed; default 256 rows is
    # safe on v5e/v6e/v7x (~20 MB VMEM including double buffers).
    tb = _round_up(min(batch_tile, _round_up(B, 8)), 8)
    B_pad = _round_up(B, tb)
    if B_pad != B:
        x = jnp.pad(x, ((0, B_pad - B), (0, 0)))

    flat_params = _prepare_params(params)
    n_tiles = B_pad // tb

    def const_block(arr):
        # Grid-invariant weight/bias block: same block index every step, so
        # the pipeline fetches it once and keeps it resident in VMEM.
        return pl.BlockSpec(arr.shape, lambda i: (0, 0))

    in_specs = [pl.BlockSpec((tb, IN_DIM), lambda i: (i, 0))]
    in_specs += [const_block(p) for p in flat_params]

    out_shape = (
        jax.ShapeDtypeStruct((B_pad, IN_DIM), jnp.float32),      # x2
        jax.ShapeDtypeStruct((B_pad, LATENT_PAD), jnp.float32),  # x1 (padded)
    )
    out_specs = (
        pl.BlockSpec((tb, IN_DIM), lambda i: (i, 0)),
        pl.BlockSpec((tb, LATENT_PAD), lambda i: (i, 0)),
    )

    # Advisory cost estimate for XLA's scheduler (two big + six tiny matmuls).
    flops_per_row = 2 * (IN_DIM * 128 * 2 + 128 * 64 * 2 + 64 * 12 * 2
                         + 12 * LATENT_PAD + LATENT_PAD * 12)
    bytes_accessed = (B_pad * IN_DIM * 4          # x in
                      + B_pad * IN_DIM * 4        # x2 out
                      + B_pad * LATENT_PAD * 4    # x1 out
                      + 2 * IN_DIM * 128 * 2)     # big weights (bf16)
    cost = pl.CostEstimate(flops=B_pad * flops_per_row,
                           transcendentals=B_pad * IN_DIM,   # tanh
                           bytes_accessed=bytes_accessed)

    fn = pl.pallas_call(
        _fcn_ae_kernel,
        out_shape=out_shape,
        grid_spec=pltpu.PrefetchScalarGridSpec(
            num_scalar_prefetch=0,
            grid=(n_tiles,),
            in_specs=in_specs,
            out_specs=out_specs,
        ),
        compiler_params=pltpu.CompilerParams(
            dimension_semantics=("parallel",),
            vmem_limit_bytes=_VMEM_LIMIT,
        ),
        cost_estimate=cost,
    )
    x2, x1_padded = fn(x, *flat_params)
    return x2[:B], x1_padded[:B, :LATENT_DIM]


def init_params(key):
    """Deterministic init mimicking PyTorch nn.Linear default (U[-1/sqrt(fan_in), +])."""
    params = []
    for (din, dout) in ENC_DIMS + DEC_DIMS:
        key, kw, kb = jax.random.split(key, 3)
        bound = 1.0 / jnp.sqrt(float(din))
        w = jax.random.uniform(kw, (din, dout), jnp.float32, -bound, bound)
        b = jax.random.uniform(kb, (1, dout), jnp.float32, -bound, bound)
        params.append((w, b))
    return params


def reference_forward(x, params):
    """Plain-JAX f32 reference of the same forward pass."""
    h = x
    for idx, (w, b) in enumerate(params[:4]):
        h = h @ w + b
        if idx < 3:
            h = jnp.maximum(h, 0.0)
    x1 = h
    h = x1
    for idx, (w, b) in enumerate(params[4:]):
        h = h @ w + b
        if idx < 3:
            h = jnp.maximum(h, 0.0)
    x2 = jnp.tanh(h)
    return x2, x1


if __name__ == "__main__":
    key = jax.random.PRNGKey(0)
    kx, kp, kx2 = jax.random.split(key, 3)

    params = init_params(kp)

    # Primary small-shape check (batch=2, padded to one 8-row tile).
    B = 2
    x = jax.random.normal(kx, (B, IN_DIM), dtype=jnp.float32)
    x2, x1 = fcn_autoencoder_forward(x, params)
    jax.block_until_ready((x2, x1))

    r2, r1 = reference_forward(x, params)
    assert x2.shape == (B, IN_DIM) and x1.shape == (B, LATENT_DIM)
    # bf16 operands on the two big layers -> loosened tolerances vs f32 ref.
    assert jnp.allclose(x1, r1, atol=5e-2, rtol=5e-2)
    assert jnp.allclose(x2, r2, atol=5e-2, rtol=5e-2)

    # Multi-tile check: batch 20 padded to 32, split over a 2-step grid.
    Bm = 20
    xm = jax.random.normal(kx2, (Bm, IN_DIM), dtype=jnp.float32)
    x2m, x1m = fcn_autoencoder_forward(xm, params, batch_tile=16)
    jax.block_until_ready((x2m, x1m))

    r2m, r1m = reference_forward(xm, params)
    assert x2m.shape == (Bm, IN_DIM) and x1m.shape == (Bm, LATENT_DIM)
    assert jnp.allclose(x1m, r1m, atol=5e-2, rtol=5e-2)
    assert jnp.allclose(x2m, r2m, atol=5e-2, rtol=5e-2)

    print("KERNEL_OK")
</pallas_src>

<mosaic_0001>
module attributes {stable_mosaic.version = 11 : i64} {
  func.func @_fcn_ae_kernel(%arg0: i32, %arg1: memref<8x3072xf32, #tpu.memory_space<vmem>>, %arg2: memref<3072x128xbf16, #tpu.memory_space<vmem>>, %arg3: memref<1x128xf32, #tpu.memory_space<vmem>>, %arg4: memref<128x64xf32, #tpu.memory_space<vmem>>, %arg5: memref<1x64xf32, #tpu.memory_space<vmem>>, %arg6: memref<64x12xf32, #tpu.memory_space<vmem>>, %arg7: memref<1x12xf32, #tpu.memory_space<vmem>>, %arg8: memref<12x128xf32, #tpu.memory_space<vmem>>, %arg9: memref<1x128xf32, #tpu.memory_space<vmem>>, %arg10: memref<128x12xf32, #tpu.memory_space<vmem>>, %arg11: memref<1x12xf32, #tpu.memory_space<vmem>>, %arg12: memref<12x64xf32, #tpu.memory_space<vmem>>, %arg13: memref<1x64xf32, #tpu.memory_space<vmem>>, %arg14: memref<64x128xf32, #tpu.memory_space<vmem>>, %arg15: memref<1x128xf32, #tpu.memory_space<vmem>>, %arg16: memref<128x3072xbf16, #tpu.memory_space<vmem>>, %arg17: memref<1x3072xf32, #tpu.memory_space<vmem>>, %arg18: memref<8x3072xf32, #tpu.memory_space<vmem>>, %arg19: memref<8x128xf32, #tpu.memory_space<vmem>>) attributes {dimension_semantics = [#tpu.dimension_semantics<parallel>], iteration_bounds = array<i64: 1>, scalar_prefetch = 0 : i64, scratch_operands = 0 : i64, tpu.core_type = #tpu.core_type<tc>, window_params = [{transform_indices = @transform_0, window_bounds = array<i64: 8, 3072>}, {pipeline_mode = #tpu.pipeline_mode<synchronous>, transform_indices = @transform_1, window_bounds = array<i64: 3072, 128>}, {pipeline_mode = #tpu.pipeline_mode<synchronous>, transform_indices = @transform_2, window_bounds = array<i64: 1, 128>}, {pipeline_mode = #tpu.pipeline_mode<synchronous>, transform_indices = @transform_3, window_bounds = array<i64: 128, 64>}, {pipeline_mode = #tpu.pipeline_mode<synchronous>, transform_indices = @transform_4, window_bounds = array<i64: 1, 64>}, {pipeline_mode = #tpu.pipeline_mode<synchronous>, transform_indices = @transform_5, window_bounds = array<i64: 64, 12>}, {pipeline_mode = #tpu.pipeline_mode<synchronous>, transform_indices = @transform_6, window_bounds = array<i64: 1, 12>}, {pipeline_mode = #tpu.pipeline_mode<synchronous>, transform_indices = @transform_7, window_bounds = array<i64: 12, 128>}, {pipeline_mode = #tpu.pipeline_mode<synchronous>, transform_indices = @transform_8, window_bounds = array<i64: 1, 128>}, {pipeline_mode = #tpu.pipeline_mode<synchronous>, transform_indices = @transform_9, window_bounds = array<i64: 128, 12>}, {pipeline_mode = #tpu.pipeline_mode<synchronous>, transform_indices = @transform_10, window_bounds = array<i64: 1, 12>}, {pipeline_mode = #tpu.pipeline_mode<synchronous>, transform_indices = @transform_11, window_bounds = array<i64: 12, 64>}, {pipeline_mode = #tpu.pipeline_mode<synchronous>, transform_indices = @transform_12, window_bounds = array<i64: 1, 64>}, {pipeline_mode = #tpu.pipeline_mode<synchronous>, transform_indices = @transform_13, window_bounds = array<i64: 64, 128>}, {pipeline_mode = #tpu.pipeline_mode<synchronous>, transform_indices = @transform_14, window_bounds = array<i64: 1, 128>}, {pipeline_mode = #tpu.pipeline_mode<synchronous>, transform_indices = @transform_15, window_bounds = array<i64: 128, 3072>}, {pipeline_mode = #tpu.pipeline_mode<synchronous>, transform_indices = @transform_16, window_bounds = array<i64: 1, 3072>}, {transform_indices = @transform_17, window_bounds = array<i64: 8, 3072>}, {transform_indices = @transform_18, window_bounds = array<i64: 8, 128>}]} {
    %c0 = arith.constant 0 : index
    %c0_0 = arith.constant 0 : index
    %0 = vector.load %arg1[%c0, %c0_0] : memref<8x3072xf32, #tpu.memory_space<vmem>>, vector<8x3072xf32>
    %1 = arith.truncf %0 : vector<8x3072xf32> to vector<8x3072xbf16>
    %c0_1 = arith.constant 0 : index
    %c0_2 = arith.constant 0 : index
    %2 = vector.load %arg2[%c0_1, %c0_2] : memref<3072x128xbf16, #tpu.memory_space<vmem>>, vector<3072x128xbf16>
    %cst = arith.constant dense<0.000000e+00> : vector<8x128xf32>
    %3 = tpu.matmul %1, %2, %cst {dimension_numbers = #tpu.dot_dimension_numbers<[1], [0], [0], [1], [0, 0, 1, 1], [], []>} : vector<8x3072xbf16>, vector<3072x128xbf16>, vector<8x128xf32> -> vector<8x128xf32>
    %c0_3 = arith.constant 0 : index
    %c0_4 = arith.constant 0 : index
    %4 = vector.load %arg3[%c0_3, %c0_4] : memref<1x128xf32, #tpu.memory_space<vmem>>, vector<1x128xf32>
    %5 = vector.broadcast %4 : vector<1x128xf32> to vector<8x128xf32>
    %6 = arith.addf %3, %5 : vector<8x128xf32>
    %cst_5 = arith.constant 0.000000e+00 : f32
    %7 = vector.broadcast %cst_5 : f32 to vector<8x128xf32>
    %8 = arith.maximumf %6, %7 : vector<8x128xf32>
    %c0_6 = arith.constant 0 : index
    %c0_7 = arith.constant 0 : index
    %9 = vector.load %arg4[%c0_6, %c0_7] : memref<128x64xf32, #tpu.memory_space<vmem>>, vector<128x64xf32>
    %cst_8 = arith.constant dense<0.000000e+00> : vector<8x64xf32>
    %10 = tpu.matmul %8, %9, %cst_8 {dimension_numbers = #tpu.dot_dimension_numbers<[1], [0], [0], [1], [0, 0, 1, 1], [], []>} : vector<8x128xf32>, vector<128x64xf32>, vector<8x64xf32> -> vector<8x64xf32>
    %c0_9 = arith.constant 0 : index
    %c0_10 = arith.constant 0 : index
    %11 = vector.load %arg5[%c0_9, %c0_10] : memref<1x64xf32, #tpu.memory_space<vmem>>, vector<1x64xf32>
    %12 = vector.broadcast %11 : vector<1x64xf32> to vector<8x64xf32>
    %13 = arith.addf %10, %12 : vector<8x64xf32>
    %cst_11 = arith.constant 0.000000e+00 : f32
    %14 = vector.broadcast %cst_11 : f32 to vector<8x64xf32>
    %15 = arith.maximumf %13, %14 : vector<8x64xf32>
    %c0_12 = arith.constant 0 : index
    %c0_13 = arith.constant 0 : index
    %16 = vector.load %arg6[%c0_12, %c0_13] : memref<64x12xf32, #tpu.memory_space<vmem>>, vector<64x12xf32>
    %cst_14 = arith.constant dense<0.000000e+00> : vector<8x12xf32>
    %17 = tpu.matmul %15, %16, %cst_14 {dimension_numbers = #tpu.dot_dimension_numbers<[1], [0], [0], [1], [0, 0, 1, 1], [], []>} : vector<8x64xf32>, vector<64x12xf32>, vector<8x12xf32> -> vector<8x12xf32>
    %c0_15 = arith.constant 0 : index
    %c0_16 = arith.constant 0 : index
    %18 = vector.load %arg7[%c0_15, %c0_16] : memref<1x12xf32, #tpu.memory_space<vmem>>, vector<1x12xf32>
    %19 = vector.broadcast %18 : vector<1x12xf32> to vector<8x12xf32>
    %20 = arith.addf %17, %19 : vector<8x12xf32>
    %cst_17 = arith.constant 0.000000e+00 : f32
    %21 = vector.broadcast %cst_17 : f32 to vector<8x12xf32>
    %22 = arith.maximumf %20, %21 : vector<8x12xf32>
    %c0_18 = arith.constant 0 : index
    %c0_19 = arith.constant 0 : index
    %23 = vector.load %arg8[%c0_18, %c0_19] : memref<12x128xf32, #tpu.memory_space<vmem>>, vector<12x128xf32>
    %cst_20 = arith.constant dense<0.000000e+00> : vector<8x128xf32>
    %24 = tpu.matmul %22, %23, %cst_20 {dimension_numbers = #tpu.dot_dimension_numbers<[1], [0], [0], [1], [0, 0, 1, 1], [], []>} : vector<8x12xf32>, vector<12x128xf32>, vector<8x128xf32> -> vector<8x128xf32>
    %c0_21 = arith.constant 0 : index
    %c0_22 = arith.constant 0 : index
    %25 = vector.load %arg9[%c0_21, %c0_22] : memref<1x128xf32, #tpu.memory_space<vmem>>, vector<1x128xf32>
    %26 = vector.broadcast %25 : vector<1x128xf32> to vector<8x128xf32>
    %27 = arith.addf %24, %26 : vector<8x128xf32>
    %c0_23 = arith.constant 0 : index
    %c0_24 = arith.constant 0 : index
    %28 = vector.load %arg19[%c0_23, %c0_24] : memref<8x128xf32, #tpu.memory_space<vmem>>, vector<8x128xf32>
    tpu.vector_store %arg19[%c0_23, %c0_24], %27 {strides = array<i32>} : memref<8x128xf32, #tpu.memory_space<vmem>>, vector<8x128xf32>,
    %c0_25 = arith.constant 0 : index
    %c0_26 = arith.constant 0 : index
    %29 = vector.load %arg10[%c0_25, %c0_26] : memref<128x12xf32, #tpu.memory_space<vmem>>, vector<128x12xf32>
    %cst_27 = arith.constant dense<0.000000e+00> : vector<8x12xf32>
    %30 = tpu.matmul %27, %29, %cst_27 {dimension_numbers = #tpu.dot_dimension_numbers<[1], [0], [0], [1], [0, 0, 1, 1], [], []>} : vector<8x128xf32>, vector<128x12xf32>, vector<8x12xf32> -> vector<8x12xf32>
    %c0_28 = arith.constant 0 : index
    %c0_29 = arith.constant 0 : index
    %31 = vector.load %arg11[%c0_28, %c0_29] : memref<1x12xf32, #tpu.memory_space<vmem>>, vector<1x12xf32>
    %32 = vector.broadcast %31 : vector<1x12xf32> to vector<8x12xf32>
    %33 = arith.addf %30, %32 : vector<8x12xf32>
    %cst_30 = arith.constant 0.000000e+00 : f32
    %34 = vector.broadcast %cst_30 : f32 to vector<8x12xf32>
    %35 = arith.maximumf %33, %34 : vector<8x12xf32>
    %c0_31 = arith.constant 0 : index
    %c0_32 = arith.constant 0 : index
    %36 = vector.load %arg12[%c0_31, %c0_32] : memref<12x64xf32, #tpu.memory_space<vmem>>, vector<12x64xf32>
    %cst_33 = arith.constant dense<0.000000e+00> : vector<8x64xf32>
    %37 = tpu.matmul %35, %36, %cst_33 {dimension_numbers = #tpu.dot_dimension_numbers<[1], [0], [0], [1], [0, 0, 1, 1], [], []>} : vector<8x12xf32>, vector<12x64xf32>, vector<8x64xf32> -> vector<8x64xf32>
    %c0_34 = arith.constant 0 : index
    %c0_35 = arith.constant 0 : index
    %38 = vector.load %arg13[%c0_34, %c0_35] : memref<1x64xf32, #tpu.memory_space<vmem>>, vector<1x64xf32>
    %39 = vector.broadcast %38 : vector<1x64xf32> to vector<8x64xf32>
    %40 = arith.addf %37, %39 : vector<8x64xf32>
    %cst_36 = arith.constant 0.000000e+00 : f32
    %41 = vector.broadcast %cst_36 : f32 to vector<8x64xf32>
    %42 = arith.maximumf %40, %41 : vector<8x64xf32>
    %c0_37 = arith.constant 0 : index
    %c0_38 = arith.constant 0 : index
    %43 = vector.load %arg14[%c0_37, %c0_38] : memref<64x128xf32, #tpu.memory_space<vmem>>, vector<64x128xf32>
    %cst_39 = arith.constant dense<0.000000e+00> : vector<8x128xf32>
    %44 = tpu.matmul %42, %43, %cst_39 {dimension_numbers = #tpu.dot_dimension_numbers<[1], [0], [0], [1], [0, 0, 1, 1], [], []>} : vector<8x64xf32>, vector<64x128xf32>, vector<8x128xf32> -> vector<8x128xf32>
    %c0_40 = arith.constant 0 : index
    %c0_41 = arith.constant 0 : index
    %45 = vector.load %arg15[%c0_40, %c0_41] : memref<1x128xf32, #tpu.memory_space<vmem>>, vector<1x128xf32>
    %46 = vector.broadcast %45 : vector<1x128xf32> to vector<8x128xf32>
    %47 = arith.addf %44, %46 : vector<8x128xf32>
    %cst_42 = arith.constant 0.000000e+00 : f32
    %48 = vector.broadcast %cst_42 : f32 to vector<8x128xf32>
    %49 = arith.maximumf %47, %48 : vector<8x128xf32>
    %50 = arith.truncf %49 : vector<8x128xf32> to vector<8x128xbf16>
    %c0_43 = arith.constant 0 : index
    %c0_44 = arith.constant 0 : index
    %51 = vector.load %arg16[%c0_43, %c0_44] : memref<128x3072xbf16, #tpu.memory_space<vmem>>, vector<128x3072xbf16>
    %cst_45 = arith.constant dense<0.000000e+00> : vector<8x3072xf32>
    %52 = tpu.matmul %50, %51, %cst_45 {dimension_numbers = #tpu.dot_dimension_numbers<[1], [0], [0], [1], [0, 0, 1, 1], [], []>} : vector<8x128xbf16>, vector<128x3072xbf16>, vector<8x3072xf32> -> vector<8x3072xf32>
    %c0_46 = arith.constant 0 : index
    %c0_47 = arith.constant 0 : index
    %53 = vector.load %arg17[%c0_46, %c0_47] : memref<1x3072xf32, #tpu.memory_space<vmem>>, vector<1x3072xf32>
    %54 = vector.broadcast %53 : vector<1x3072xf32> to vector<8x3072xf32>
    %55 = arith.addf %52, %54 : vector<8x3072xf32>
    %56 = math.tanh %55 : vector<8x3072xf32>
    %c0_48 = arith.constant 0 : index
    %c0_49 = arith.constant 0 : index
    %57 = vector.load %arg18[%c0_48, %c0_49] : memref<8x3072xf32, #tpu.memory_space<vmem>>, vector<8x3072xf32>
    tpu.vector_store %arg18[%c0_48, %c0_49], %56 {strides = array<i32>} : memref<8x3072xf32, #tpu.memory_space<vmem>>, vector<8x3072xf32>,
    return
  }
  func.func @transform_0(%arg0: i32) -> (i32, i32) {
    %c0_i32 = arith.constant 0 : i32
    %c0_i32_0 = arith.constant 0 : i32
    return %arg0, %c0_i32 : i32, i32
  }
  func.func @transform_1(%arg0: i32) -> (i32, i32) {
    %c0_i32 = arith.constant 0 : i32
    %c0_i32_0 = arith.constant 0 : i32
    %c0_i32_1 = arith.constant 0 : i32
    return %c0_i32, %c0_i32_0 : i32, i32
  }
  func.func @transform_2(%arg0: i32) -> (i32, i32) {
    %c0_i32 = arith.constant 0 : i32
    %c0_i32_0 = arith.constant 0 : i32
    %c0_i32_1 = arith.constant 0 : i32
    return %c0_i32, %c0_i32_0 : i32, i32
  }
  func.func @transform_3(%arg0: i32) -> (i32, i32) {
    %c0_i32 = arith.constant 0 : i32
    %c0_i32_0 = arith.constant 0 : i32
    %c0_i32_1 = arith.constant 0 : i32
    return %c0_i32, %c0_i32_0 : i32, i32
  }
  func.func @transform_4(%arg0: i32) -> (i32, i32) {
    %c0_i32 = arith.constant 0 : i32
    %c0_i32_0 = arith.constant 0 : i32
    %c0_i32_1 = arith.constant 0 : i32
    return %c0_i32, %c0_i32_0 : i32, i32
  }
  func.func @transform_5(%arg0: i32) -> (i32, i32) {
    %c0_i32 = arith.constant 0 : i32
    %c0_i32_0 = arith.constant 0 : i32
    %c0_i32_1 = arith.constant 0 : i32
    return %c0_i32, %c0_i32_0 : i32, i32
  }
  func.func @transform_6(%arg0: i32) -> (i32, i32) {
    %c0_i32 = arith.constant 0 : i32
    %c0_i32_0 = arith.constant 0 : i32
    %c0_i32_1 = arith.constant 0 : i32
    return %c0_i32, %c0_i32_0 : i32, i32
  }
  func.func @transform_7(%arg0: i32) -> (i32, i32) {
    %c0_i32 = arith.constant 0 : i32
    %c0_i32_0 = arith.constant 0 : i32
    %c0_i32_1 = arith.constant 0 : i32
    return %c0_i32, %c0_i32_0 : i32, i32
  }
  func.func @transform_8(%arg0: i32) -> (i32, i32) {
    %c0_i32 = arith.constant 0 : i32
    %c0_i32_0 = arith.constant 0 : i32
    %c0_i32_1 = arith.constant 0 : i32
    return %c0_i32, %c0_i32_0 : i32, i32
  }
  func.func @transform_9(%arg0: i32) -> (i32, i32) {
    %c0_i32 = arith.constant 0 : i32
    %c0_i32_0 = arith.constant 0 : i32
    %c0_i32_1 = arith.constant 0 : i32
    return %c0_i32, %c0_i32_0 : i32, i32
  }
  func.func @transform_10(%arg0: i32) -> (i32, i32) {
    %c0_i32 = arith.constant 0 : i32
    %c0_i32_0 = arith.constant 0 : i32
    %c0_i32_1 = arith.constant 0 : i32
    return %c0_i32, %c0_i32_0 : i32, i32
  }
  func.func @transform_11(%arg0: i32) -> (i32, i32) {
    %c0_i32 = arith.constant 0 : i32
    %c0_i32_0 = arith.constant 0 : i32
    %c0_i32_1 = arith.constant 0 : i32
    return %c0_i32, %c0_i32_0 : i32, i32
  }
  func.func @transform_12(%arg0: i32) -> (i32, i32) {
    %c0_i32 = arith.constant 0 : i32
    %c0_i32_0 = arith.constant 0 : i32
    %c0_i32_1 = arith.constant 0 : i32
    return %c0_i32, %c0_i32_0 : i32, i32
  }
  func.func @transform_13(%arg0: i32) -> (i32, i32) {
    %c0_i32 = arith.constant 0 : i32
    %c0_i32_0 = arith.constant 0 : i32
    %c0_i32_1 = arith.constant 0 : i32
    return %c0_i32, %c0_i32_0 : i32, i32
  }
  func.func @transform_14(%arg0: i32) -> (i32, i32) {
    %c0_i32 = arith.constant 0 : i32
    %c0_i32_0 = arith.constant 0 : i32
    %c0_i32_1 = arith.constant 0 : i32
    return %c0_i32, %c0_i32_0 : i32, i32
  }
  func.func @transform_15(%arg0: i32) -> (i32, i32) {
    %c0_i32 = arith.constant 0 : i32
    %c0_i32_0 = arith.constant 0 : i32
    %c0_i32_1 = arith.constant 0 : i32
    return %c0_i32, %c0_i32_0 : i32, i32
  }
  func.func @transform_16(%arg0: i32) -> (i32, i32) {
    %c0_i32 = arith.constant 0 : i32
    %c0_i32_0 = arith.constant 0 : i32
    %c0_i32_1 = arith.constant 0 : i32
    return %c0_i32, %c0_i32_0 : i32, i32
  }
  func.func @transform_17(%arg0: i32) -> (i32, i32) {
    %c0_i32 = arith.constant 0 : i32
    %c0_i32_0 = arith.constant 0 : i32
    return %arg0, %c0_i32 : i32, i32
  }
  func.func @transform_18(%arg0: i32) -> (i32, i32) {
    %c0_i32 = arith.constant 0 : i32
    %c0_i32_0 = arith.constant 0 : i32
    return %arg0, %c0_i32 : i32, i32
  }
}

</mosaic_0001>

<bundles_post_ra>
// kernel: fcn_autoencoder_forward.1
= control target key start
LH: loop header
LB: loop body
LE: loop exit
PB: predicated region body
PF: predicated region fallthrough
CT: control target
= control target key end

     0   :  { %vm5584_vm0 = vmmov 0   ;;  %vm2240_vm1 = vcmask 523264   ;;  %vm2328_vm2 = vcmask 1043456   ;;  %vm2324_vm3 = vcmask 97280   ;;  %s7302_s1 = inlined_call_operand.vmem [shape: bf16[3072,128], index: 1, kind: input, shape index: {}]   ;;  %s7303_s0 = inlined_call_operand.vmem [shape: f32[8,3072], index: 0, kind: input, shape index: {}]   ;;  %s7304_s2 = inlined_call_operand.vmem [shape: f32[1,128], index: 2, kind: input, shape index: {}]   ;;  %s7305_s3 = inlined_call_operand.vmem [shape: f32[128,64], index: 3, kind: input, shape index: {}]   ;;  %s7306_s5 = inlined_call_operand.vmem [shape: f32[64,12], index: 5, kind: input, shape index: {}]   ;;  %s7307_s4 = inlined_call_operand.vmem [shape: f32[1,64], index: 4, kind: input, shape index: {}]   ;;  %s7308_s7 = inlined_call_operand.vmem [shape: f32[12,128], index: 7, kind: input, shape index: {}]   ;;  %s7309_s6 = inlined_call_operand.vmem [shape: f32[1,12], index: 6, kind: input, shape index: {}]   ;;  %s7310_s9 = inlined_call_operand.vmem [shape: f32[128,12], index: 9, kind: input, shape index: {}]   ;;  %s7311_s8 = inlined_call_operand.vmem [shape: f32[1,128], index: 8, kind: input, shape index: {}]   ;;  %s7312_s18 = inlined_call_operand.vmem [shape: f32[8,128], index: 18, kind: output, shape index: {1}]   ;;  %s7313_s11 = inlined_call_operand.vmem [shape: f32[12,64], index: 11, kind: input, shape index: {}]   ;;  %s7314_s10 = inlined_call_operand.vmem [shape: f32[1,12], index: 10, kind: input, shape index: {}]   ;;  %s7315_s13 = inlined_call_operand.vmem [shape: f32[64,128], index: 13, kind: input, shape index: {}]   ;;  %s7316_s15 = inlined_call_operand.vmem [shape: bf16[128,3072], index: 15, kind: input, shape index: {}]   ;;  %s7317_s12 = inlined_call_operand.vmem [shape: f32[1,64], index: 12, kind: input, shape index: {}]   ;;  %s7318_s14 = inlined_call_operand.vmem [shape: f32[1,128], index: 14, kind: input, shape index: {}]   ;;  %s7319_s16 = inlined_call_operand.vmem [shape: f32[1,3072], index: 16, kind: input, shape index: {}]   ;;  %s7320_s17 = inlined_call_operand.vmem [shape: f32[8,3072], index: 17, kind: output, shape index: {0}]  }
   0x1   :  { %7323 = sst [smem:[#allocation2_spill]] %s7302_s1 }
   0x2   :  { %7324 = sst [smem:[#allocation3_spill]] %s7303_s0 }
   0x3   :  { %7325 = sst [smem:[#allocation4_spill]] %s7304_s2 }
   0x4   :  { %s7326_s29 = sld [smem:[#allocation2_spill]] }
   0x5   :  { %s7327_s23 = sld [smem:[#allocation3_spill]] }
   0x6   :  { %s7328_s27 = sld [smem:[#allocation4_spill]] }
   0xa   :  { %v5343_v0 = vld [vmem:[%s7326_s29 + $0x78] sm:$0xff]   ;;  %v5347_v4 = vld [vmem:[%s7326_s29 + $0x70] sm:$0xff]   ;;  %v5351_v8 = vld [vmem:[%s7326_s29 + $0x68] sm:$0xff]  }
   0xb   :  { %v5344_v1 = vld [vmem:[%s7326_s29 + $0xf8] sm:$0xff]   ;;  %4896 = vmatprep.subr.bf16.mxu0 %v5343_v0  ;;  %v5348_v5 = vld [vmem:[%s7326_s29 + $0xf0] sm:$0xff]   ;;  %v5352_v9 = vld [vmem:[%s7326_s29 + $0xe8] sm:$0xff]  }
   0xc   :  { %v5345_v2 = vld [vmem:[%s7326_s29 + $0x38] sm:$0xff]   ;;  %4918 = vmatprep.subr.bf16.mxu1 %v5344_v1  ;;  %v5349_v6 = vld [vmem:[%s7326_s29 + $0x30] sm:$0xff]   ;;  %v5353_v10 = vld [vmem:[%s7326_s29 + $0x28] sm:$0xff]  }
   0xd   :  { %v5346_v3 = vld [vmem:[%s7326_s29 + $0xb8] sm:$0xff]   ;;  %4897 = vmatpush3.bf16.msra.mxu0 %v5345_v2  ;;  %v5350_v7 = vld [vmem:[%s7326_s29 + $0xb0] sm:$0xff]   ;;  %v5354_v11 = vld [vmem:[%s7326_s29 + $0xa8] sm:$0xff]  }
   0xe   :  { %4919 = vmatpush3.bf16.msra.mxu1 %v5346_v3  ;;  %4898 = vmatprep.subr.bf16.mxu0 %v5347_v4  ;;  %v5355_v12 = vld [vmem:[%s7326_s29 + $0x60] sm:$0xff]   ;;  %v5359_v16 = vld [vmem:[%s7326_s29 + $0x58] sm:$0xff]   ;;  %v5363_v20 = vld [vmem:[%s7326_s29 + $0x50] sm:$0xff]  }
   0xf   :  { %4920 = vmatprep.subr.bf16.mxu1 %v5348_v5  ;;  %v5356_v13 = vld [vmem:[%s7326_s29 + $0xe0] sm:$0xff]   ;;  %v5360_v17 = vld [vmem:[%s7326_s29 + $0xd8] sm:$0xff]   ;;  %v5364_v21 = vld [vmem:[%s7326_s29 + $0xd0] sm:$0xff]  }
  0x10   :  { %v5357_v14 = vld [vmem:[%s7326_s29 + $0x20] sm:$0xff]   ;;  %v5361_v18 = vld [vmem:[%s7326_s29 + $0x18] sm:$0xff]   ;;  %v5365_v22 = vld [vmem:[%s7326_s29 + $0x10] sm:$0xff]  }
  0x11   :  { %4899 = vmatpush3.bf16.msra.mxu0 %v5349_v6  ;;  %v5358_v15 = vld [vmem:[%s7326_s29 + $0xa0] sm:$0xff]   ;;  %v5362_v19 = vld [vmem:[%s7326_s29 + $0x98] sm:$0xff]   ;;  %v5366_v23 = vld [vmem:[%s7326_s29 + $0x90] sm:$0xff]  }
  0x12   :  { %4921 = vmatpush3.bf16.msra.mxu1 %v5350_v7  ;;  %4900 = vmatprep.subr.bf16.mxu0 %v5351_v8  ;;  %v5367_v24 = vld [vmem:[%s7326_s29 + $0x48] sm:$0xff]   ;;  %v5371_v28 = vld [vmem:[%s7326_s29 + $0x40] sm:$0xff]   ;;  %v62_v33 = vld [vmem:[%s7327_s23 + $0x18] sm:$0xff] }
  0x13   :  { %4922 = vmatprep.subr.bf16.mxu1 %v5352_v9  ;;  %v5368_v25 = vld [vmem:[%s7326_s29 + $0xc8] sm:$0xff]   ;;  %v5372_v29 = vld [vmem:[%s7326_s29 + $0xc0] sm:$0xff]   ;;  %v86_v36 = vpack.c.bf16 %v62_v33, %v62_v33  ;;  %v61_v38 = vld [vmem:[%s7327_s23 + $0x10] sm:$0xff] }
  0x14   :  { %v5369_v26 = vld [vmem:[%s7326_s29 + $0x8] sm:$0xff]   ;;  %v5373_v30 = vld [vmem:[%s7326_s29] sm:$0xff]   ;;  %v85_v39 = vpack.c.bf16 %v61_v38, %v61_v38  ;;  %v5375_v40 = vld [vmem:[%s7326_s29 + $0x178] sm:$0xff]  }
  0x15   :  { %4901 = vmatpush3.bf16.msra.mxu0 %v5353_v10  ;;  %v5370_v27 = vld [vmem:[%s7326_s29 + $0x88] sm:$0xff]   ;;  %v5374_v31 = vld [vmem:[%s7326_s29 + $0x80] sm:$0xff]   ;;  %1722 = vmatprep.mubr.bf16.mxu1 %v86_v36  ;;  %v5376_v41 = vld [vmem:[%s7326_s29 + $0x1f8] sm:$0xff]  }
  0x16   :  { %4923 = vmatpush3.bf16.msra.mxu1 %v5354_v11  ;;  %4902 = vmatprep.subr.bf16.mxu0 %v5355_v12  ;;  %v60_v32 = vld [vmem:[%s7327_s23 + $0x8] sm:$0xff]  ;;  %v59_v34 = vld [vmem:[%s7327_s23] sm:$0xff]  ;;  %v5377_v42 = vld [vmem:[%s7326_s29 + $0x138] sm:$0xff]  }
  0x17   :  { %4924 = vmatprep.subr.bf16.mxu1 %v5356_v13  ;;  %v84_v35 = vpack.c.bf16 %v60_v32, %v60_v32  ;;  %v83_v37 = vpack.c.bf16 %v59_v34, %v59_v34  ;;  %v5378_v43 = vld [vmem:[%s7326_s29 + $0x1b8] sm:$0xff]   ;;  %v5379_v44 = vld [vmem:[%s7326_s29 + $0x170] sm:$0xff]   ;;  %v5383_v48 = vld [vmem:[%s7326_s29 + $0x168] sm:$0xff]  }
  0x18   :  { %v5380_v45 = vld [vmem:[%s7326_s29 + $0x1f0] sm:$0xff]   ;;  %v5384_v49 = vld [vmem:[%s7326_s29 + $0x1e8] sm:$0xff]   ;;  %v5387_v52 = vld [vmem:[%s7326_s29 + $0x160] sm:$0xff]  }
  0x19   :  { %4903 = vmatpush3.bf16.msra.mxu0 %v5357_v14  ;;  %1682 = vmatprep.mubr.bf16.mxu0 %v84_v35  ;;  %v5381_v46 = vld [vmem:[%s7326_s29 + $0x130] sm:$0xff]   ;;  %v5385_v50 = vld [vmem:[%s7326_s29 + $0x128] sm:$0xff]   ;;  %v5388_v53 = vld [vmem:[%s7326_s29 + $0x1e0] sm:$0xff]  }
  0x1a   :  { %4925 = vmatpush3.bf16.msra.mxu1 %v5358_v15  ;;  %4904 = vmatprep.subr.bf16.mxu0 %v5359_v16  ;;  %v5382_v47 = vld [vmem:[%s7326_s29 + $0x1b0] sm:$0xff]   ;;  %v5386_v51 = vld [vmem:[%s7326_s29 + $0x1a8] sm:$0xff]   ;;  %v5389_v54 = vld [vmem:[%s7326_s29 + $0x120] sm:$0xff]  }
  0x1b   :  { %4926 = vmatprep.subr.bf16.mxu1 %v5360_v17  ;;  %v5390_v55 = vld [vmem:[%s7326_s29 + $0x1a0] sm:$0xff]   ;;  %v5391_v56 = vld [vmem:[%s7326_s29 + $0x158] sm:$0xff]   ;;  %v5395_v60 = vld [vmem:[%s7326_s29 + $0x150] sm:$0xff]  }
  0x1c   :  { %v5392_v57 = vld [vmem:[%s7326_s29 + $0x1d8] sm:$0xff]   ;;  %v5396_v61 = vld [vmem:[%s7326_s29 + $0x1d0] sm:$0xff]   ;;  %v5399_v0 = vld [vmem:[%s7326_s29 + $0x148] sm:$0xff]  }
  0x1d   :  { %4905 = vmatpush3.bf16.msra.mxu0 %v5361_v18  ;;  %v5393_v58 = vld [vmem:[%s7326_s29 + $0x118] sm:$0xff]   ;;  %v5397_v62 = vld [vmem:[%s7326_s29 + $0x110] sm:$0xff]   ;;  %v5400_v1 = vld [vmem:[%s7326_s29 + $0x1c8] sm:$0xff]  }
  0x1e   :  { %4927 = vmatpush3.bf16.msra.mxu1 %v5362_v19  ;;  %4906 = vmatprep.subr.bf16.mxu0 %v5363_v20  ;;  %v5394_v59 = vld [vmem:[%s7326_s29 + $0x198] sm:$0xff]   ;;  %v5398_v63 = vld [vmem:[%s7326_s29 + $0x190] sm:$0xff]   ;;  %v5401_v2 = vld [vmem:[%s7326_s29 + $0x108] sm:$0xff]  }
  0x1f   :  { %4928 = vmatprep.subr.bf16.mxu1 %v5364_v21  ;;  %v5402_v3 = vld [vmem:[%s7326_s29 + $0x188] sm:$0xff]   ;;  %v5403_v4 = vld [vmem:[%s7326_s29 + $0x140] sm:$0xff]   ;;  %v66_v9 = vld [vmem:[%s7327_s23 + $0x38] sm:$0xff] }
  0x20   :  { %v5404_v5 = vld [vmem:[%s7326_s29 + $0x1c0] sm:$0xff]   ;;  %v64_v8 = vld [vmem:[%s7327_s23 + $0x28] sm:$0xff]  ;;  %v90_v11 = vpack.c.bf16 %v66_v9, %v66_v9  ;;  %v65_v13 = vld [vmem:[%s7327_s23 + $0x30] sm:$0xff] }
  0x21   :  { %4907 = vmatpush3.bf16.msra.mxu0 %v5365_v22  ;;  %v5405_v6 = vld [vmem:[%s7326_s29 + $0x100] sm:$0xff]   ;;  %v88_v10 = vpack.c.bf16 %v64_v8, %v64_v8  ;;  %v89_v15 = vpack.c.bf16 %v65_v13, %v65_v13  ;;  %v5407_v16 = vld [vmem:[%s7326_s29 + $0x278] sm:$0xff]   ;;  %v5411_v20 = vld [vmem:[%s7326_s29 + $0x270] sm:$0xff]  }
  0x22   :  { %4929 = vmatpush3.bf16.msra.mxu1 %v5366_v23  ;;  %4908 = vmatprep.subr.bf16.mxu0 %v5367_v24  ;;  %v5406_v7 = vld [vmem:[%s7326_s29 + $0x180] sm:$0xff]   ;;  %v5408_v17 = vld [vmem:[%s7326_s29 + $0x2f8] sm:$0xff]   ;;  %v5412_v21 = vld [vmem:[%s7326_s29 + $0x2f0] sm:$0xff]  }
  0x23   :  { %4930 = vmatprep.subr.bf16.mxu1 %v5368_v25  ;;  %v63_v12 = vld [vmem:[%s7327_s23 + $0x20] sm:$0xff]  ;;  %v5409_v18 = vld [vmem:[%s7326_s29 + $0x238] sm:$0xff]   ;;  %v5413_v22 = vld [vmem:[%s7326_s29 + $0x230] sm:$0xff]  }
  0x24   :  { %v87_v14 = vpack.c.bf16 %v63_v12, %v63_v12  ;;  %v5410_v19 = vld [vmem:[%s7326_s29 + $0x2b8] sm:$0xff]   ;;  %v5414_v23 = vld [vmem:[%s7326_s29 + $0x2b0] sm:$0xff]   ;;  %v5415_v24 = vld [vmem:[%s7326_s29 + $0x268] sm:$0xff]  }
  0x25   :  { %4909 = vmatpush3.bf16.msra.mxu0 %v5369_v26  ;;  %v5416_v25 = vld [vmem:[%s7326_s29 + $0x2e8] sm:$0xff]   ;;  %v5423_v32 = vld [vmem:[%s7326_s29 + $0x258] sm:$0xff]   ;;  %v5427_v36 = vld [vmem:[%s7326_s29 + $0x250] sm:$0xff]  }
  0x26   :  { %4931 = vmatpush3.bf16.msra.mxu1 %v5370_v27  ;;  %4910 = vmatprep.subr.bf16.mxu0 %v5371_v28  ;;  %v5417_v26 = vld [vmem:[%s7326_s29 + $0x228] sm:$0xff]   ;;  %v5419_v28 = vld [vmem:[%s7326_s29 + $0x260] sm:$0xff]   ;;  %v5424_v33 = vld [vmem:[%s7326_s29 + $0x2d8] sm:$0xff]  }
  0x27   :  { %4932 = vmatprep.subr.bf16.mxu1 %v5372_v29  ;;  %v5418_v27 = vld [vmem:[%s7326_s29 + $0x2a8] sm:$0xff]   ;;  %v5420_v29 = vld [vmem:[%s7326_s29 + $0x2e0] sm:$0xff]   ;;  %v5425_v34 = vld [vmem:[%s7326_s29 + $0x218] sm:$0xff]  }
  0x28   :  { %v5426_v35 = vld [vmem:[%s7326_s29 + $0x298] sm:$0xff]   ;;  %v5429_v38 = vld [vmem:[%s7326_s29 + $0x210] sm:$0xff]  }
  0x29   :  { %4911 = vmatpush3.bf16.msra.mxu0 %v5373_v30  ;;  %v5421_v30 = vld [vmem:[%s7326_s29 + $0x220] sm:$0xff]   ;;  %v5455_v8 = vld [vmem:[%s7326_s29 + $0x358] sm:$0xff]   ;;  %v5459_v12 = vld [vmem:[%s7326_s29 + $0x350] sm:$0xff]  }
  0x2a   :  { %4933 = vmatpush3.bf16.msra.mxu1 %v5374_v31  ;;  %4940 = vmatprep.subr.bf16.mxu0 %v5375_v40  ;;  %v5422_v31 = vld [vmem:[%s7326_s29 + $0x2a0] sm:$0xff]   ;;  %v5431_v40 = vld [vmem:[%s7326_s29 + $0x248] sm:$0xff]   ;;  %v5456_v9 = vld [vmem:[%s7326_s29 + $0x3d8] sm:$0xff]  }
  0x2b   :  { %4962 = vmatprep.subr.bf16.mxu1 %v5376_v41  ;;  %v5432_v41 = vld [vmem:[%s7326_s29 + $0x2c8] sm:$0xff]   ;;  %v5460_v13 = vld [vmem:[%s7326_s29 + $0x3d0] sm:$0xff]  }
  0x2c   :  { %1683 = vmatmul.mubr.bf16.vlgmr.msra.gmra.mxu0 %v83_v37  ;;  %v5428_v37 = vld [vmem:[%s7326_s29 + $0x2d0] sm:$0xff]  }
  0x2d   :  { %1723 = vmatmul.mubr.bf16.vlgmr.msra.gmra.mxu1 %v85_v39  ;;  %4941 = vmatpush3.bf16.msra.mxu0 %v5377_v42  ;;  %v5430_v39 = vld [vmem:[%s7326_s29 + $0x290] sm:$0xff]   ;;  %v5433_v42 = vld [vmem:[%s7326_s29 + $0x208] sm:$0xff]  }
  0x2e   :  { %4963 = vmatpush3.bf16.msra.mxu1 %v5378_v43  ;;  %4942 = vmatprep.subr.bf16.mxu0 %v5379_v44  ;;  %v5434_v43 = vld [vmem:[%s7326_s29 + $0x288] sm:$0xff]   ;;  %v5435_v44 = vld [vmem:[%s7326_s29 + $0x240] sm:$0xff]  }
  0x2f   :  { %4964 = vmatprep.subr.bf16.mxu1 %v5380_v45  ;;  %1762 = vmatprep.mubr.bf16.mxu0 %v88_v10  ;;  %v5436_v45 = vld [vmem:[%s7326_s29 + $0x2c0] sm:$0xff]   ;;  %v5457_v10 = vld [vmem:[%s7326_s29 + $0x318] sm:$0xff]  }
  0x30   :  { %1802 = vmatprep.mubr.bf16.mxu1 %v90_v11  ;;  %v5458_v11 = vld [vmem:[%s7326_s29 + $0x398] sm:$0xff]  }
  0x31   :  { %4943 = vmatpush3.bf16.msra.mxu0 %v5381_v46  ;;  %v5437_v46 = vld [vmem:[%s7326_s29 + $0x200] sm:$0xff]  }
  0x32   :  { %4965 = vmatpush3.bf16.msra.mxu1 %v5382_v47  ;;  %4944 = vmatprep.subr.bf16.mxu0 %v5383_v48  ;;  %v5438_v47 = vld [vmem:[%s7326_s29 + $0x280] sm:$0xff]   ;;  %v68_v48 = vld [vmem:[%s7327_s23 + $0x48] sm:$0xff] }
  0x33   :  { %4966 = vmatprep.subr.bf16.mxu1 %v5384_v49  ;;  %v92_v49 = vpack.c.bf16 %v68_v48, %v68_v48  ;;  %v5487_v48 = vld [vmem:[%s7326_s29 + $0x458] sm:$0xff]  }
  0x35   :  { %4945 = vmatpush3.bf16.msra.mxu0 %v5385_v50  ;;  %v70_v50 = vld [vmem:[%s7327_s23 + $0x58] sm:$0xff] }
  0x36   :  { %4967 = vmatpush3.bf16.msra.mxu1 %v5386_v51  ;;  %4946 = vmatprep.subr.bf16.mxu0 %v5387_v52  ;;  %v67_v51 = vld [vmem:[%s7327_s23 + $0x40] sm:$0xff]  ;;  %v69_v52 = vld [vmem:[%s7327_s23 + $0x50] sm:$0xff] }
  0x37   :  { %4968 = vmatprep.subr.bf16.mxu1 %v5388_v53  ;;  %v94_v53 = vpack.c.bf16 %v70_v50, %v70_v50  ;;  %v5489_v50 = vld [vmem:[%s7326_s29 + $0x418] sm:$0xff]  }
  0x39   :  { %4947 = vmatpush3.bf16.msra.mxu0 %v5389_v54  ;;  %v91_v54 = vpack.c.bf16 %v67_v51, %v67_v51  ;;  %v5490_v51 = vld [vmem:[%s7326_s29 + $0x498] sm:$0xff]  }
  0x3a   :  { %4969 = vmatpush3.bf16.msra.mxu1 %v5390_v55  ;;  %4948 = vmatprep.subr.bf16.mxu0 %v5391_v56  ;;  %v93_v55 = vpack.c.bf16 %v69_v52, %v69_v52  ;;  %v5439_v56 = vld [vmem:[%s7326_s29 + $0x378] sm:$0xff]   ;;  %v5491_v52 = vld [vmem:[%s7326_s29 + $0x450] sm:$0xff]  }
  0x3b   :  { %4970 = vmatprep.subr.bf16.mxu1 %v5392_v57  ;;  %v5440_v57 = vld [vmem:[%s7326_s29 + $0x3f8] sm:$0xff]  }
  0x3d   :  { %4949 = vmatpush3.bf16.msra.mxu0 %v5393_v58  ;;  %v5441_v58 = vld [vmem:[%s7326_s29 + $0x338] sm:$0xff]  }
  0x3e   :  { %4971 = vmatpush3.bf16.msra.mxu1 %v5394_v59  ;;  %4950 = vmatprep.subr.bf16.mxu0 %v5395_v60  ;;  %v5442_v59 = vld [vmem:[%s7326_s29 + $0x3b8] sm:$0xff]   ;;  %v5443_v60 = vld [vmem:[%s7326_s29 + $0x370] sm:$0xff]  }
  0x3f   :  { %4972 = vmatprep.subr.bf16.mxu1 %v5396_v61  ;;  %v5444_v61 = vld [vmem:[%s7326_s29 + $0x3f0] sm:$0xff]  }
  0x41   :  { %4951 = vmatpush3.bf16.msra.mxu0 %v5397_v62  ;;  %v5445_v62 = vld [vmem:[%s7326_s29 + $0x330] sm:$0xff]  }
  0x42   :  { %4973 = vmatpush3.bf16.msra.mxu1 %v5398_v63  ;;  %4952 = vmatprep.subr.bf16.mxu0 %v5399_v0  ;;  %v5446_v63 = vld [vmem:[%s7326_s29 + $0x3b0] sm:$0xff]   ;;  %v5447_v0 = vld [vmem:[%s7326_s29 + $0x368] sm:$0xff]  }
  0x43   :  { %4974 = vmatprep.subr.bf16.mxu1 %v5400_v1  ;;  %v5448_v1 = vld [vmem:[%s7326_s29 + $0x3e8] sm:$0xff]  }
  0x45   :  { %4953 = vmatpush3.bf16.msra.mxu0 %v5401_v2  ;;  %v5449_v2 = vld [vmem:[%s7326_s29 + $0x328] sm:$0xff]  }
  0x46   :  { %4975 = vmatpush3.bf16.msra.mxu1 %v5402_v3  ;;  %4954 = vmatprep.subr.bf16.mxu0 %v5403_v4  ;;  %v5450_v3 = vld [vmem:[%s7326_s29 + $0x3a8] sm:$0xff]   ;;  %v5451_v4 = vld [vmem:[%s7326_s29 + $0x360] sm:$0xff]  }
  0x47   :  { %4976 = vmatprep.subr.bf16.mxu1 %v5404_v5  ;;  %v5452_v5 = vld [vmem:[%s7326_s29 + $0x3e0] sm:$0xff]  }
  0x49   :  { %4955 = vmatpush3.bf16.msra.mxu0 %v5405_v6  ;;  %v5453_v6 = vld [vmem:[%s7326_s29 + $0x320] sm:$0xff]  }
  0x4a   :  { %4977 = vmatpush3.bf16.msra.mxu1 %v5406_v7  ;;  %4984 = vmatprep.subr.bf16.mxu0 %v5407_v16  ;;  %v5454_v7 = vld [vmem:[%s7326_s29 + $0x3a0] sm:$0xff]   ;;  %v5463_v16 = vld [vmem:[%s7326_s29 + $0x348] sm:$0xff]  }
  0x4b   :  { %5006 = vmatprep.subr.bf16.mxu1 %v5408_v17  ;;  %v5464_v17 = vld [vmem:[%s7326_s29 + $0x3c8] sm:$0xff]  }
  0x4c   :  { %1763 = vmatmul.mubr.bf16.vlgmr.msra.gmra.mxu0 %v87_v14  ;;  %v5461_v14 = vld [vmem:[%s7326_s29 + $0x310] sm:$0xff]  }
  0x4d   :  { %1803 = vmatmul.mubr.bf16.vlgmr.msra.gmra.mxu1 %v89_v15  ;;  %4985 = vmatpush3.bf16.msra.mxu0 %v5409_v18  ;;  %v5462_v15 = vld [vmem:[%s7326_s29 + $0x390] sm:$0xff]   ;;  %v5465_v18 = vld [vmem:[%s7326_s29 + $0x308] sm:$0xff]  }
  0x4e   :  { %5007 = vmatpush3.bf16.msra.mxu1 %v5410_v19  ;;  %4986 = vmatprep.subr.bf16.mxu0 %v5411_v20  ;;  %v5466_v19 = vld [vmem:[%s7326_s29 + $0x388] sm:$0xff]   ;;  %v5467_v20 = vld [vmem:[%s7326_s29 + $0x340] sm:$0xff]  }
  0x4f   :  { %5008 = vmatprep.subr.bf16.mxu1 %v5412_v21  ;;  %1842 = vmatprep.mubr.bf16.mxu0 %v92_v49  ;;  %v5468_v21 = vld [vmem:[%s7326_s29 + $0x3c0] sm:$0xff]   ;;  %v5488_v49 = vld [vmem:[%s7326_s29 + $0x4d8] sm:$0xff]  }
  0x50   :  { %1882 = vmatprep.mubr.bf16.mxu1 %v94_v53  ;;  %v5492_v53 = vld [vmem:[%s7326_s29 + $0x4d0] sm:$0xff]  }
  0x51   :  { %4987 = vmatpush3.bf16.msra.mxu0 %v5413_v22  ;;  %v5469_v22 = vld [vmem:[%s7326_s29 + $0x300] sm:$0xff]  }
  0x52   :  { %5009 = vmatpush3.bf16.msra.mxu1 %v5414_v23  ;;  %4988 = vmatprep.subr.bf16.mxu0 %v5415_v24  ;;  %v5470_v23 = vld [vmem:[%s7326_s29 + $0x380] sm:$0xff]   ;;  %v72_v24 = vld [vmem:[%s7327_s23 + $0x68] sm:$0xff] }
  0x53   :  { %5010 = vmatprep.subr.bf16.mxu1 %v5416_v25  ;;  %v74_v25 = vld [vmem:[%s7327_s23 + $0x78] sm:$0xff] }
  0x55   :  { %4989 = vmatpush3.bf16.msra.mxu0 %v5417_v26  ;;  %v71_v26 = vld [vmem:[%s7327_s23 + $0x60] sm:$0xff] }
  0x56   :  { %5011 = vmatpush3.bf16.msra.mxu1 %v5418_v27  ;;  %4990 = vmatprep.subr.bf16.mxu0 %v5419_v28  ;;  %v96_v27 = vpack.c.bf16 %v72_v24, %v72_v24  ;;  %v98_v28 = vpack.c.bf16 %v74_v25, %v74_v25  ;;  %v5519_v24 = vld [vmem:[%s7326_s29 + $0x558] sm:$0xff]  }
  0x57   :  { %5012 = vmatprep.subr.bf16.mxu1 %v5420_v29  ;;  %v95_v29 = vpack.c.bf16 %v71_v26, %v71_v26  ;;  %v5520_v25 = vld [vmem:[%s7326_s29 + $0x5d8] sm:$0xff]  }
  0x58   :  { %v5521_v26 = vld [vmem:[%s7326_s29 + $0x518] sm:$0xff]  }
  0x59   :  { %4991 = vmatpush3.bf16.msra.mxu0 %v5421_v30  ;;  %v73_v30 = vld [vmem:[%s7327_s23 + $0x70] sm:$0xff] }
  0x5a   :  { %5013 = vmatpush3.bf16.msra.mxu1 %v5422_v31  ;;  %4992 = vmatprep.subr.bf16.mxu0 %v5423_v32  ;;  %v97_v31 = vpack.c.bf16 %v73_v30, %v73_v30  ;;  %v5471_v32 = vld [vmem:[%s7326_s29 + $0x478] sm:$0xff]   ;;  %v5525_v30 = vld [vmem:[%s7326_s29 + $0x510] sm:$0xff]  }
  0x5b   :  { %5014 = vmatprep.subr.bf16.mxu1 %v5424_v33  ;;  %v5472_v33 = vld [vmem:[%s7326_s29 + $0x4f8] sm:$0xff]  }
  0x5d   :  { %4993 = vmatpush3.bf16.msra.mxu0 %v5425_v34  ;;  %v5473_v34 = vld [vmem:[%s7326_s29 + $0x438] sm:$0xff]  }
  0x5e   :  { %5015 = vmatpush3.bf16.msra.mxu1 %v5426_v35  ;;  %4994 = vmatprep.subr.bf16.mxu0 %v5427_v36  ;;  %v5474_v35 = vld [vmem:[%s7326_s29 + $0x4b8] sm:$0xff]   ;;  %v5475_v36 = vld [vmem:[%s7326_s29 + $0x470] sm:$0xff]  }
  0x5f   :  { %5016 = vmatprep.subr.bf16.mxu1 %v5428_v37  ;;  %v5476_v37 = vld [vmem:[%s7326_s29 + $0x4f0] sm:$0xff]  }
  0x61   :  { %4995 = vmatpush3.bf16.msra.mxu0 %v5429_v38  ;;  %v5477_v38 = vld [vmem:[%s7326_s29 + $0x430] sm:$0xff]  }
  0x62   :  { %5017 = vmatpush3.bf16.msra.mxu1 %v5430_v39  ;;  %4996 = vmatprep.subr.bf16.mxu0 %v5431_v40  ;;  %v5478_v39 = vld [vmem:[%s7326_s29 + $0x4b0] sm:$0xff]   ;;  %v5479_v40 = vld [vmem:[%s7326_s29 + $0x468] sm:$0xff]  }
  0x63   :  { %5018 = vmatprep.subr.bf16.mxu1 %v5432_v41  ;;  %v5480_v41 = vld [vmem:[%s7326_s29 + $0x4e8] sm:$0xff]  }
  0x65   :  { %4997 = vmatpush3.bf16.msra.mxu0 %v5433_v42  ;;  %v5481_v42 = vld [vmem:[%s7326_s29 + $0x428] sm:$0xff]  }
  0x66   :  { %5019 = vmatpush3.bf16.msra.mxu1 %v5434_v43  ;;  %4998 = vmatprep.subr.bf16.mxu0 %v5435_v44  ;;  %v5482_v43 = vld [vmem:[%s7326_s29 + $0x4a8] sm:$0xff]   ;;  %v5483_v44 = vld [vmem:[%s7326_s29 + $0x460] sm:$0xff]  }
  0x67   :  { %5020 = vmatprep.subr.bf16.mxu1 %v5436_v45  ;;  %v5484_v45 = vld [vmem:[%s7326_s29 + $0x4e0] sm:$0xff]  }
  0x69   :  { %4999 = vmatpush3.bf16.msra.mxu0 %v5437_v46  ;;  %v5485_v46 = vld [vmem:[%s7326_s29 + $0x420] sm:$0xff]  }
  0x6a   :  { %5021 = vmatpush3.bf16.msra.mxu1 %v5438_v47  ;;  %5028 = vmatprep.subr.bf16.mxu0 %v5439_v56  ;;  %v5486_v47 = vld [vmem:[%s7326_s29 + $0x4a0] sm:$0xff]   ;;  %v5495_v56 = vld [vmem:[%s7326_s29 + $0x448] sm:$0xff]  }
  0x6b   :  { %5050 = vmatprep.subr.bf16.mxu1 %v5440_v57  ;;  %v5496_v57 = vld [vmem:[%s7326_s29 + $0x4c8] sm:$0xff]  }
  0x6c   :  { %1843 = vmatmul.mubr.bf16.vlgmr.msra.gmra.mxu0 %v91_v54  ;;  %v5493_v54 = vld [vmem:[%s7326_s29 + $0x410] sm:$0xff]  }
  0x6d   :  { %1883 = vmatmul.mubr.bf16.vlgmr.msra.gmra.mxu1 %v93_v55  ;;  %5029 = vmatpush3.bf16.msra.mxu0 %v5441_v58  ;;  %v5494_v55 = vld [vmem:[%s7326_s29 + $0x490] sm:$0xff]   ;;  %v5497_v58 = vld [vmem:[%s7326_s29 + $0x408] sm:$0xff]  }
  0x6e   :  { %5051 = vmatpush3.bf16.msra.mxu1 %v5442_v59  ;;  %5030 = vmatprep.subr.bf16.mxu0 %v5443_v60  ;;  %v5498_v59 = vld [vmem:[%s7326_s29 + $0x488] sm:$0xff]   ;;  %v5499_v60 = vld [vmem:[%s7326_s29 + $0x440] sm:$0xff]  }
  0x6f   :  { %5052 = vmatprep.subr.bf16.mxu1 %v5444_v61  ;;  %1922 = vmatprep.mubr.bf16.mxu0 %v96_v27  ;;  %v5500_v61 = vld [vmem:[%s7326_s29 + $0x4c0] sm:$0xff]   ;;  %v5522_v27 = vld [vmem:[%s7326_s29 + $0x598] sm:$0xff]  }
  0x70   :  { %1962 = vmatprep.mubr.bf16.mxu1 %v98_v28  ;;  %v5523_v28 = vld [vmem:[%s7326_s29 + $0x550] sm:$0xff]  }
  0x71   :  { %5031 = vmatpush3.bf16.msra.mxu0 %v5445_v62  ;;  %v5501_v62 = vld [vmem:[%s7326_s29 + $0x400] sm:$0xff]  }
  0x72   :  { %5053 = vmatpush3.bf16.msra.mxu1 %v5446_v63  ;;  %5032 = vmatprep.subr.bf16.mxu0 %v5447_v0  ;;  %v5502_v63 = vld [vmem:[%s7326_s29 + $0x480] sm:$0xff]   ;;  %v76_v0 = vld [vmem:[%s7327_s23 + $0x88] sm:$0xff] }
  0x73   :  { %5054 = vmatprep.subr.bf16.mxu1 %v5448_v1  ;;  %v78_v1 = vld [vmem:[%s7327_s23 + $0x98] sm:$0xff] }
  0x75   :  { %5033 = vmatpush3.bf16.msra.mxu0 %v5449_v2  ;;  %v100_v2 = vpack.c.bf16 %v76_v0, %v76_v0  ;;  %v2144_v0 = vld [vmem:[%s7305_s3 + $0x68] sm:$0xff] }
  0x76   :  { %5055 = vmatpush3.bf16.msra.mxu1 %v5450_v3  ;;  %5034 = vmatprep.subr.bf16.mxu0 %v5451_v4  ;;  %v102_v3 = vpack.c.bf16 %v78_v1, %v78_v1  ;;  %v75_v4 = vld [vmem:[%s7327_s23 + $0x80] sm:$0xff] }
  0x77   :  { %5056 = vmatprep.subr.bf16.mxu1 %v5452_v5  ;;  %v77_v5 = vld [vmem:[%s7327_s23 + $0x90] sm:$0xff]  ;;  %v2143_v1 = vld [vmem:[%s7305_s3 + $0x60] sm:$0xff] }
  0x79   :  { %5035 = vmatpush3.bf16.msra.mxu0 %v5453_v6  ;;  %v99_v6 = vpack.c.bf16 %v75_v4, %v75_v4  ;;  %v2140_v4 = vld [vmem:[%s7305_s3 + $0x48] sm:$0xff] }
  0x7a   :  { %5057 = vmatpush3.bf16.msra.mxu1 %v5454_v7  ;;  %5036 = vmatprep.subr.bf16.mxu0 %v5455_v8  ;;  %v101_v7 = vpack.c.bf16 %v77_v5, %v77_v5  ;;  %v5503_v8 = vld [vmem:[%s7326_s29 + $0x578] sm:$0xff]   ;;  %v2139_v5 = vld [vmem:[%s7305_s3 + $0x40] sm:$0xff] }
  0x7b   :  { %5058 = vmatprep.subr.bf16.mxu1 %v5456_v9  ;;  %v5504_v9 = vld [vmem:[%s7326_s29 + $0x5f8] sm:$0xff]  }
  0x7d   :  { %5037 = vmatpush3.bf16.msra.mxu0 %v5457_v10  ;;  %v5505_v10 = vld [vmem:[%s7326_s29 + $0x538] sm:$0xff]  }
  0x7e   :  { %5059 = vmatpush3.bf16.msra.mxu1 %v5458_v11  ;;  %5038 = vmatprep.subr.bf16.mxu0 %v5459_v12  ;;  %v5506_v11 = vld [vmem:[%s7326_s29 + $0x5b8] sm:$0xff]   ;;  %v5507_v12 = vld [vmem:[%s7326_s29 + $0x570] sm:$0xff]  }
  0x7f   :  { %5060 = vmatprep.subr.bf16.mxu1 %v5460_v13  ;;  %v5508_v13 = vld [vmem:[%s7326_s29 + $0x5f0] sm:$0xff]  }
  0x81   :  { %5039 = vmatpush3.bf16.msra.mxu0 %v5461_v14  ;;  %v5509_v14 = vld [vmem:[%s7326_s29 + $0x530] sm:$0xff]  }
  0x82   :  { %5061 = vmatpush3.bf16.msra.mxu1 %v5462_v15  ;;  %5040 = vmatprep.subr.bf16.mxu0 %v5463_v16  ;;  %v5510_v15 = vld [vmem:[%s7326_s29 + $0x5b0] sm:$0xff]   ;;  %v5511_v16 = vld [vmem:[%s7326_s29 + $0x568] sm:$0xff]  }
  0x83   :  { %5062 = vmatprep.subr.bf16.mxu1 %v5464_v17  ;;  %v5512_v17 = vld [vmem:[%s7326_s29 + $0x5e8] sm:$0xff]  }
  0x85   :  { %5041 = vmatpush3.bf16.msra.mxu0 %v5465_v18  ;;  %v5513_v18 = vld [vmem:[%s7326_s29 + $0x528] sm:$0xff]  }
  0x86   :  { %5063 = vmatpush3.bf16.msra.mxu1 %v5466_v19  ;;  %5042 = vmatprep.subr.bf16.mxu0 %v5467_v20  ;;  %v5514_v19 = vld [vmem:[%s7326_s29 + $0x5a8] sm:$0xff]   ;;  %v5515_v20 = vld [vmem:[%s7326_s29 + $0x560] sm:$0xff]  }
  0x87   :  { %5064 = vmatprep.subr.bf16.mxu1 %v5468_v21  ;;  %v5516_v21 = vld [vmem:[%s7326_s29 + $0x5e0] sm:$0xff]  }
  0x89   :  { %5043 = vmatpush3.bf16.msra.mxu0 %v5469_v22  ;;  %v5517_v22 = vld [vmem:[%s7326_s29 + $0x520] sm:$0xff]  }
  0x8a   :  { %5065 = vmatpush3.bf16.msra.mxu1 %v5470_v23  ;;  %5072 = vmatprep.subr.bf16.mxu0 %v5471_v32  ;;  %v5518_v23 = vld [vmem:[%s7326_s29 + $0x5a0] sm:$0xff]   ;;  %v5527_v32 = vld [vmem:[%s7326_s29 + $0x548] sm:$0xff]  }
  0x8b   :  { %5094 = vmatprep.subr.bf16.mxu1 %v5472_v33  ;;  %v5528_v33 = vld [vmem:[%s7326_s29 + $0x5c8] sm:$0xff]  }
  0x8c   :  { %1923 = vmatmul.mubr.bf16.vlgmr.msra.gmra.mxu0 %v95_v29  ;;  %v5524_v29 = vld [vmem:[%s7326_s29 + $0x5d0] sm:$0xff]  }
  0x8d   :  { %1963 = vmatmul.mubr.bf16.vlgmr.msra.gmra.mxu1 %v97_v31  ;;  %5073 = vmatpush3.bf16.msra.mxu0 %v5473_v34  ;;  %v5526_v31 = vld [vmem:[%s7326_s29 + $0x590] sm:$0xff]   ;;  %v5529_v34 = vld [vmem:[%s7326_s29 + $0x508] sm:$0xff]  }
  0x8e   :  { %5095 = vmatpush3.bf16.msra.mxu1 %v5474_v35  ;;  %5074 = vmatprep.subr.bf16.mxu0 %v5475_v36  ;;  %v5530_v35 = vld [vmem:[%s7326_s29 + $0x588] sm:$0xff]   ;;  %v5531_v36 = vld [vmem:[%s7326_s29 + $0x540] sm:$0xff]  }
  0x8f   :  { %5096 = vmatprep.subr.bf16.mxu1 %v5476_v37  ;;  %2002 = vmatprep.mubr.bf16.mxu0 %v100_v2  ;;  %v5532_v37 = vld [vmem:[%s7326_s29 + $0x5c0] sm:$0xff]   ;;  %v2142_v2 = vld [vmem:[%s7305_s3 + $0x58] sm:$0xff] }
  0x90   :  { %2042 = vmatprep.mubr.bf16.mxu1 %v102_v3  ;;  %v2141_v3 = vld [vmem:[%s7305_s3 + $0x50] sm:$0xff] }
  0x91   :  { %5075 = vmatpush3.bf16.msra.mxu0 %v5477_v38  ;;  %v5533_v38 = vld [vmem:[%s7326_s29 + $0x500] sm:$0xff]  }
  0x92   :  { %5097 = vmatpush3.bf16.msra.mxu1 %v5478_v39  ;;  %5076 = vmatprep.subr.bf16.mxu0 %v5479_v40  ;;  %v5534_v39 = vld [vmem:[%s7326_s29 + $0x580] sm:$0xff]   ;;  %v80_v40 = vld [vmem:[%s7327_s23 + $0xa8] sm:$0xff] }
  0x93   :  { %5098 = vmatprep.subr.bf16.mxu1 %v5480_v41  ;;  %v104_v41 = vpack.c.bf16 %v80_v40, %v80_v40 }
  0x95   :  { %5077 = vmatpush3.bf16.msra.mxu0 %v5481_v42  ;;  %v82_v42 = vld [vmem:[%s7327_s23 + $0xb8] sm:$0xff] }
  0x96   :  { %5099 = vmatpush3.bf16.msra.mxu1 %v5482_v43  ;;  %5078 = vmatprep.subr.bf16.mxu0 %v5483_v44  ;;  %v79_v43 = vld [vmem:[%s7327_s23 + $0xa0] sm:$0xff]  ;;  %v81_v44 = vld [vmem:[%s7327_s23 + $0xb0] sm:$0xff] }
  0x97   :  { %5100 = vmatprep.subr.bf16.mxu1 %v5484_v45  ;;  %v106_v45 = vpack.c.bf16 %v82_v42, %v82_v42 }
  0x99   :  { %5079 = vmatpush3.bf16.msra.mxu0 %v5485_v46  ;;  %v103_v46 = vpack.c.bf16 %v79_v43, %v79_v43 }
  0x9a   :  { %5101 = vmatpush3.bf16.msra.mxu1 %v5486_v47  ;;  %5080 = vmatprep.subr.bf16.mxu0 %v5487_v48  ;;  %v105_v47 = vpack.c.bf16 %v81_v44, %v81_v44 }
  0x9b   :  { %5102 = vmatprep.subr.bf16.mxu1 %v5488_v49 }
  0x9d   :  { %5081 = vmatpush3.bf16.msra.mxu0 %v5489_v50  ;;  %v4499_v50 = vld [vmem:[%s7328_s27] ss:$0 sm:$0xff] }
  0x9e   :  { %5103 = vmatpush3.bf16.msra.mxu1 %v5490_v51  ;;  %5082 = vmatprep.subr.bf16.mxu0 %v5491_v52 }
  0x9f   :  { %5104 = vmatprep.subr.bf16.mxu1 %v5492_v53 }
  0xa1   :  { %5083 = vmatpush3.bf16.msra.mxu0 %v5493_v54 }
  0xa2   :  { %5105 = vmatpush3.bf16.msra.mxu1 %v5494_v55  ;;  %5084 = vmatprep.subr.bf16.mxu0 %v5495_v56 }
  0xa3   :  { %5106 = vmatprep.subr.bf16.mxu1 %v5496_v57 }
  0xa5   :  { %5085 = vmatpush3.bf16.msra.mxu0 %v5497_v58 }
  0xa6   :  { %5107 = vmatpush3.bf16.msra.mxu1 %v5498_v59  ;;  %5086 = vmatprep.subr.bf16.mxu0 %v5499_v60 }
  0xa7   :  { %5108 = vmatprep.subr.bf16.mxu1 %v5500_v61  ;;  %v5583_v61 = vmov 0.0  }
  0xa9   :  { %5087 = vmatpush3.bf16.msra.mxu0 %v5501_v62  ;;  %v2146_v62 = vld [vmem:[%s7305_s3 + $0x78] sm:$0xff] }
  0xaa   :  { %5109 = vmatpush3.bf16.msra.mxu1 %v5502_v63  ;;  %5116 = vmatprep.subr.bf16.mxu0 %v5503_v8  ;;  %v2145_v63 = vld [vmem:[%s7305_s3 + $0x70] sm:$0xff] }
  0xab   :  { %5138 = vmatprep.subr.bf16.mxu1 %v5504_v9 }
  0xac   :  { %2003 = vmatmul.mubr.bf16.vlgmr.msra.gmra.mxu0 %v99_v6  ;;  %v2138_v6 = vld [vmem:[%s7305_s3 + $0x38] sm:$0xff] }
  0xad   :  { %2043 = vmatmul.mubr.bf16.vlgmr.msra.gmra.mxu1 %v101_v7  ;;  %5117 = vmatpush3.bf16.msra.mxu0 %v5505_v10  ;;  %v2137_v7 = vld [vmem:[%s7305_s3 + $0x30] sm:$0xff] }
  0xae   :  { %5139 = vmatpush3.bf16.msra.mxu1 %v5506_v11  ;;  %5118 = vmatprep.subr.bf16.mxu0 %v5507_v12 }
  0xaf   :  { %5140 = vmatprep.subr.bf16.mxu1 %v5508_v13  ;;  %2082 = vmatprep.mubr.bf16.mxu0 %v104_v41 }
  0xb0   :  { %2122 = vmatprep.mubr.bf16.mxu1 %v106_v45 }
  0xb1   :  { %5119 = vmatpush3.bf16.msra.mxu0 %v5509_v14 }
  0xb2   :  { %5141 = vmatpush3.bf16.msra.mxu1 %v5510_v15  ;;  %5120 = vmatprep.subr.bf16.mxu0 %v5511_v16 }
  0xb3   :  { %5142 = vmatprep.subr.bf16.mxu1 %v5512_v17  ;;  %v2136_v17 = vld [vmem:[%s7305_s3 + $0x28] sm:$0xff] }
  0xb5   :  { %5121 = vmatpush3.bf16.msra.mxu0 %v5513_v18 }
  0xb6   :  { %5143 = vmatpush3.bf16.msra.mxu1 %v5514_v19  ;;  %5122 = vmatprep.subr.bf16.mxu0 %v5515_v20 }
  0xb7   :  { %5144 = vmatprep.subr.bf16.mxu1 %v5516_v21  ;;  %v2135_v21 = vld [vmem:[%s7305_s3 + $0x20] sm:$0xff] }
  0xb9   :  { %5123 = vmatpush3.bf16.msra.mxu0 %v5517_v22  ;;  %v2134_v22 = vld [vmem:[%s7305_s3 + $0x18] sm:$0xff] }
  0xba   :  { %5145 = vmatpush3.bf16.msra.mxu1 %v5518_v23  ;;  %5124 = vmatprep.subr.bf16.mxu0 %v5519_v24  ;;  %v2133_v23 = vld [vmem:[%s7305_s3 + $0x10] sm:$0xff]  ;;  %v2132_v24 = vld [vmem:[%s7305_s3 + $0x8] sm:$0xff] }
  0xbb   :  { %5146 = vmatprep.subr.bf16.mxu1 %v5520_v25  ;;  %v2131_v25 = vld [vmem:[%s7305_s3] sm:$0xff] }
  0xbd   :  { %5125 = vmatpush3.bf16.msra.mxu0 %v5521_v26  ;;  %v2232_v26 = vld [vmem:[%s7306_s5 + $0x38] sm:$0xff] }
  0xbe   :  { %5147 = vmatpush3.bf16.msra.mxu1 %v5522_v27  ;;  %5126 = vmatprep.subr.bf16.mxu0 %v5523_v28  ;;  %v2231_v27 = vld [vmem:[%s7306_s5 + $0x30] sm:$0xff]  ;;  %v2230_v28 = vld [vmem:[%s7306_s5 + $0x28] sm:$0xff] }
  0xbf   :  { %5148 = vmatprep.subr.bf16.mxu1 %v5524_v29  ;;  %v2229_v29 = vld [vmem:[%s7306_s5 + $0x20] sm:$0xff] }
  0xc1   :  { %5127 = vmatpush3.bf16.msra.mxu0 %v5525_v30  ;;  %v2228_v30 = vld [vmem:[%s7306_s5 + $0x18] sm:$0xff] }
  0xc2   :  { %5149 = vmatpush3.bf16.msra.mxu1 %v5526_v31  ;;  %5128 = vmatprep.subr.bf16.mxu0 %v5527_v32 }
  0xc3   :  { %5150 = vmatprep.subr.bf16.mxu1 %v5528_v33 }
  0xc5   :  { %5129 = vmatpush3.bf16.msra.mxu0 %v5529_v34 }
  0xc6   :  { %5151 = vmatpush3.bf16.msra.mxu1 %v5530_v35  ;;  %5130 = vmatprep.subr.bf16.mxu0 %v5531_v36 }
  0xc7   :  { %5152 = vmatprep.subr.bf16.mxu1 %v5532_v37 }
  0xc9   :  { %5131 = vmatpush3.bf16.msra.mxu0 %v5533_v38 }
  0xca   :  { %5153 = vmatpush3.bf16.msra.mxu1 %v5534_v39  ;;  %5218 = vmatprep.subr.mxu0 %v5583_v61 }
  0xcb   :  { %5253 = vmatprep.subr.mxu1 %v5583_v61 }
  0xcc   :  { %2083 = vmatmul.mubr.bf16.vlgmr.msra.gmra.mxu0 %v103_v46 }
  0xcd   :  { %2123 = vmatmul.mubr.bf16.vlgmr.msra.gmra.mxu1 %v105_v47  ;;  %5219 = vmatpush3.msra.mxu0 %v2146_v62 }
  0xce   :  { %5220 = vmatprep.subr.mxu0 %v5583_v61  ;;  %5250 = vmatprep.mubr.msk.f32.mxu0 %vm5584_vm0, %v5583_v61 }
  0xcf   :  { %5221 = vmatpush3.msra.mxu0 %v2145_v63  ;;  %5269 = vmatprep.mubr.msk.f32.mxu1 %vm5584_vm0, %v5583_v61 }
  0xd0   :  { %5222 = vmatprep.subr.mxu0 %v5583_v61  ;;  %5254 = vmatpush3.msra.mxu1 %v2232_v26  ;;  %v2315_v26 = vld [vmem:[%s7308_s7] sm:$0xff] }
  0xd1   :  { %5223 = vmatpush3.msra.mxu0 %v2144_v0  ;;  %5255 = vmatprep.subr.mxu1 %v5583_v61 }
  0xd2   :  { %5224 = vmatprep.subr.mxu0 %v5583_v61  ;;  %5256 = vmatpush3.msra.mxu1 %v2231_v27  ;;  %v4693_v27 = vld [vmem:[%s7309_s6] ss:$0 sm:$0xff] }
  0xd3   :  { %5225 = vmatpush3.msra.mxu0 %v2143_v1  ;;  %5257 = vmatprep.subr.mxu1 %v5583_v61 }
  0xd4   :  { %5226 = vmatprep.subr.mxu0 %v5583_v61  ;;  %5258 = vmatpush3.msra.mxu1 %v2230_v28 }
  0xd5   :  { %5227 = vmatpush3.msra.mxu0 %v2142_v2  ;;  %5259 = vmatprep.subr.mxu1 %v5583_v61 }
  0xd6   :  { %5228 = vmatprep.subr.mxu0 %v5583_v61  ;;  %5260 = vmatpush3.msra.mxu1 %v2229_v29 }
  0xd7   :  { %5229 = vmatpush3.msra.mxu0 %v2141_v3  ;;  %5261 = vmatprep.subr.mxu1 %v5583_v61 }
  0xd8   :  { %5230 = vmatprep.subr.mxu0 %v5583_v61  ;;  %5262 = vmatpush3.msra.mxu1 %v2228_v30 }
  0xd9   :  { %5231 = vmatpush3.msra.mxu0 %v2140_v4  ;;  %5263 = vmatprep.subr.mxu1 %v5583_v61 }
  0xda   :  { %5232 = vmatprep.subr.mxu0 %v5583_v61 }
  0xdb   :  { %5233 = vmatpush3.msra.mxu0 %v2139_v5 }
  0xdc   :  { %5234 = vmatprep.subr.mxu0 %v5583_v61 }
  0xdd   :  { %5235 = vmatpush3.msra.mxu0 %v2138_v6 }
  0xde   :  { %5236 = vmatprep.subr.mxu0 %v5583_v61 }
  0xdf   :  { %5237 = vmatpush3.msra.mxu0 %v2137_v7 }
  0xe0   :  { %5238 = vmatprep.subr.mxu0 %v5583_v61 }
  0xe1   :  { %5239 = vmatpush3.msra.mxu0 %v2136_v17  ;;  %v2227_v17 = vld [vmem:[%s7306_s5 + $0x10] sm:$0xff] }
  0xe2   :  { %5240 = vmatprep.subr.mxu0 %v5583_v61  ;;  %5264 = vmatpush3.msra.mxu1 %v2227_v17 }
  0xe3   :  { %5241 = vmatpush3.msra.mxu0 %v2135_v21  ;;  %5265 = vmatprep.subr.mxu1 %v5583_v61 }
  0xe4   :  { %5242 = vmatprep.subr.mxu0 %v5583_v61 }
  0xe5   :  { %5243 = vmatpush3.msra.mxu0 %v2134_v22 }
  0xe6   :  { %5244 = vmatprep.subr.mxu0 %v5583_v61 }
  0xe7   :  { %5245 = vmatpush3.msra.mxu0 %v2133_v23 }
  0xe8   :  { %5246 = vmatprep.subr.mxu0 %v5583_v61 }
  0xe9   :  { %5247 = vmatpush3.msra.mxu0 %v2132_v24 }
  0xea   :  { %5248 = vmatprep.subr.mxu0 %v5583_v61 }
  0xeb   :  { %5249 = vmatpush3.msra.mxu0 %v2131_v25  ;;  %v2316_v25 = vld [vmem:[%s7308_s7 + $0x8] sm:$0xf] }
  0xec   :  { %v4912_v48 = vpop.f32.mrf.mxu0  ;;  %5314 = vmatprep.subr.mxu0 %v5583_v61 }
  0xed   :  { %v4934_v49 = vpop.f32.mrf.mxu1 }
  0xee   :  { %v4913_v51 = vpop.f32.mrf.mxu0 }
  0xef   :  { %v4935_v52 = vpop.f32.mrf.mxu1  ;;  %v4914_v53 = vadd.f32 %v4913_v51, %v4912_v48 }
  0xf0   :  { %v4936_v54 = vadd.f32 %v4935_v52, %v4934_v49  ;;  %v4915_v55 = vpop.f32.mrf.mxu0 }
  0xf1   :  { %v4937_v56 = vpop.f32.mrf.mxu1  ;;  %v1685_v57 = vadd.f32 %v4914_v53, %v4499_v50 }
  0xf2   :  { %v4916_v58 = vpop.f32.mrf.mxu0 }
  0xf3   :  { %v4938_v59 = vpop.f32.mrf.mxu1  ;;  %v1725_v60 = vadd.f32 %v4936_v54, %v1685_v57 }
 0x10c   :  { %v4956_v8 = vpop.f32.mrf.mxu0 }
 0x10d   :  { %v4978_v9 = vpop.f32.mrf.mxu1 }
 0x10e   :  { %v4957_v10 = vpop.f32.mrf.mxu0 }
 0x10f   :  { %v4958_v11 = vadd.f32 %v4957_v10, %v4956_v8  ;;  %v4979_v12 = vpop.f32.mrf.mxu1 }
 0x110   :  { %v4980_v13 = vadd.f32 %v4979_v12, %v4978_v9  ;;  %v4959_v14 = vpop.f32.mrf.mxu0 }
 0x111   :  { %v1765_v15 = vadd.f32 %v4958_v11, %v1725_v60  ;;  %v4981_v16 = vpop.f32.mrf.mxu1 }
 0x112   :  { %v4960_v18 = vpop.f32.mrf.mxu0 }
 0x113   :  { %v1805_v19 = vadd.f32 %v4980_v13, %v1765_v15  ;;  %v4982_v20 = vpop.f32.mrf.mxu1  ;;  %v2226_v18 = vld [vmem:[%s7306_s5 + $0x8] sm:$0xff] }
 0x114   :  { %5266 = vmatpush3.msra.mxu1 %v2226_v18  ;;  %v4692_v20 = vld [vmem:[%s7307_s4] ss:$0 sm:$0xff] }
 0x115   :  { %5267 = vmatprep.subr.mxu1 %v5583_v61 }
 0x12c   :  { %v5000_v31 = vpop.f32.mrf.mxu0 }
 0x12d   :  { %v5022_v32 = vpop.f32.mrf.mxu1 }
 0x12e   :  { %v5001_v33 = vpop.f32.mrf.mxu0 }
 0x12f   :  { %v5002_v34 = vadd.f32 %v5001_v33, %v5000_v31  ;;  %v5023_v35 = vpop.f32.mrf.mxu1  ;;  %v2417_v33 = vld [vmem:[%s7310_s9 + $0x70] sm:$0xff] }
 0x130   :  { %v5024_v36 = vadd.f32 %v5023_v35, %v5022_v32  ;;  %v5003_v37 = vpop.f32.mrf.mxu0  ;;  %v2418_v32 = vld [vmem:[%s7310_s9 + $0x78] sm:$0xff]  ;;  %v2415_v35 = vld [vmem:[%s7310_s9 + $0x60] sm:$0xff] }
 0x131   :  { %v1845_v38 = vadd.f32 %v5002_v34, %v1805_v19  ;;  %v5025_v39 = vpop.f32.mrf.mxu1  ;;  %v2225_v19 = vld [vmem:[%s7306_s5] sm:$0xff]  ;;  %v2416_v34 = vld [vmem:[%s7310_s9 + $0x68] sm:$0xff]  ;;  %v2413_v37 = vld [vmem:[%s7310_s9 + $0x50] sm:$0xff] }
 0x132   :  { %v5004_v40 = vpop.f32.mrf.mxu0  ;;  %5268 = vmatpush3.msra.mxu1 %v2225_v19  ;;  %v2411_v39 = vld [vmem:[%s7310_s9 + $0x40] sm:$0xff]  ;;  %v2770_v19 = vld [vmem:[%s7316_s15 + $0x308] sm:$0xff] }
 0x133   :  { %v1885_v41 = vadd.f32 %v5024_v36, %v1845_v38  ;;  %v5026_v42 = vpop.f32.mrf.mxu1  ;;  %5272 = vmatprep.subr.mxu1 %v5583_v61  ;;  %v2414_v36 = vld [vmem:[%s7310_s9 + $0x58] sm:$0xff]  ;;  %v2412_v38 = vld [vmem:[%s7310_s9 + $0x48] sm:$0xff] }
 0x134   :  { %v2410_v40 = vld [vmem:[%s7310_s9 + $0x38] sm:$0xff]  ;;  %v2408_v42 = vld [vmem:[%s7310_s9 + $0x28] sm:$0xff] }
 0x14c   :  { %v5044_v43 = vpop.f32.mrf.mxu0 }
 0x14d   :  { %v5066_v44 = vpop.f32.mrf.mxu1 }
 0x14e   :  { %v5045_v45 = vpop.f32.mrf.mxu0 }
 0x14f   :  { %v5067_v46 = vpop.f32.mrf.mxu1  ;;  %v5046_v59 = vadd.f32 %v5045_v45, %v5044_v43  ;;  %v2407_v43 = vld [vmem:[%s7310_s9 + $0x20] sm:$0xff]  ;;  %v2405_v45 = vld [vmem:[%s7310_s9 + $0x10] sm:$0xff] }
 0x150   :  { %v5047_v47 = vpop.f32.mrf.mxu0  ;;  %v5068_v62 = vadd.f32 %v5067_v46, %v5066_v44  ;;  %v2406_v44 = vld [vmem:[%s7310_s9 + $0x18] sm:$0xff]  ;;  %v2404_v46 = vld [vmem:[%s7310_s9 + $0x8] sm:$0xff] }
 0x151   :  { %v5069_v48 = vpop.f32.mrf.mxu1  ;;  %v1925_v60 = vadd.f32 %v5046_v59, %v1885_v41  ;;  %v2409_v41 = vld [vmem:[%s7310_s9 + $0x30] sm:$0xff]  ;;  %v2403_v47 = vld [vmem:[%s7310_s9] sm:$0xff]  ;;  %v2590_v59 = vld [vmem:[%s7315_s13 + $0x38] sm:$0xff] }
 0x152   :  { %v5048_v49 = vpop.f32.mrf.mxu0  ;;  %v4695_v48 = vld [vmem:[%s7311_s8] ss:$0 sm:$0xff] }
 0x153   :  { %v5070_v50 = vpop.f32.mrf.mxu1  ;;  %v1965_v0 = vadd.f32 %v5068_v62, %v1925_v60  ;;  %v2589_v60 = vld [vmem:[%s7315_s13 + $0x30] sm:$0xff]  ;;  %v2588_v62 = vld [vmem:[%s7315_s13 + $0x28] sm:$0xff] }
 0x16c   :  { %v5088_v51 = vpop.f32.mrf.mxu0 }
 0x16d   :  { %v5110_v52 = vpop.f32.mrf.mxu1 }
 0x16e   :  { %v5089_v53 = vpop.f32.mrf.mxu0 }
 0x16f   :  { %v5111_v54 = vpop.f32.mrf.mxu1  ;;  %v5090_v63 = vadd.f32 %v5089_v53, %v5088_v51  ;;  %v2497_v53 = vld [vmem:[%s7313_s11] sm:$0xff] }
 0x170   :  { %v5091_v55 = vpop.f32.mrf.mxu0  ;;  %v5112_v2 = vadd.f32 %v5111_v54, %v5110_v52  ;;  %v2498_v52 = vld [vmem:[%s7313_s11 + $0x8] sm:$0xf]  ;;  %v4698_v54 = vld [vmem:[%s7314_s10] ss:$0 sm:$0xff] }
 0x171   :  { %v5113_v56 = vpop.f32.mrf.mxu1  ;;  %v2005_v1 = vadd.f32 %v5090_v63, %v1965_v0  ;;  %v2587_v63 = vld [vmem:[%s7315_s13 + $0x20] sm:$0xff]  ;;  %v2586_v0 = vld [vmem:[%s7315_s13 + $0x18] sm:$0xff] }
 0x172   :  { %v5092_v57 = vpop.f32.mrf.mxu0 }
 0x173   :  { %v5114_v58 = vpop.f32.mrf.mxu1  ;;  %v2045_v6 = vadd.f32 %v5112_v2, %v2005_v1  ;;  %v2585_v1 = vld [vmem:[%s7315_s13 + $0x10] sm:$0xff]  ;;  %v2584_v2 = vld [vmem:[%s7315_s13 + $0x8] sm:$0xff] }
 0x18c   :  { %v5132_v3 = vpop.f32.mrf.mxu0 }
 0x18d   :  { %v5154_v4 = vpop.f32.mrf.mxu1 }
 0x18e   :  { %v5133_v5 = vpop.f32.mrf.mxu0 }
 0x18f   :  { %v5134_v7 = vadd.f32 %v5133_v5, %v5132_v3  ;;  %v5155_v8 = vpop.f32.mrf.mxu1  ;;  %v2583_v3 = vld [vmem:[%s7315_s13] sm:$0xff] }
 0x190   :  { %v5135_v9 = vpop.f32.mrf.mxu0  ;;  %v5156_v11 = vadd.f32 %v5155_v8, %v5154_v4  ;;  %v2841_v4 = vld [vmem:[%s7316_s15 + $0x540] sm:$0xff] }
 0x191   :  { %v2085_v10 = vadd.f32 %v5134_v7, %v2045_v6  ;;  %v5157_v12 = vpop.f32.mrf.mxu1  ;;  %v2853_v5 = vld [vmem:[%s7316_s15 + $0x5a0] sm:$0xff]  ;;  %v2842_v6 = vld [vmem:[%s7316_s15 + $0x548] sm:$0xff] }
 0x192   :  { %v5136_v13 = vpop.f32.mrf.mxu0  ;;  %v4872_v7 = vcombine.low %v2841_v4, %v2853_v5  ;;  %v4873_v8 = vcombine.high %v2841_v4, %v2853_v5  ;;  %v2854_v9 = vld [vmem:[%s7316_s15 + $0x5a8] sm:$0xff] }
 0x193   :  { %v2125_v14 = vadd.f32 %v5156_v11, %v2085_v10  ;;  %v5158_v15 = vpop.f32.mrf.mxu1  ;;  %v4875_v10 = vcombine.high %v2842_v6, %v2854_v9  ;;  %v2818_v11 = vld [vmem:[%s7316_s15 + $0x488] sm:$0xff] }
 0x194   :  { %v2830_v12 = vld [vmem:[%s7316_s15 + $0x4e8] sm:$0xff] }
 0x195   :  { %v2130_v16 = vmax.f32 %v2125_v14, 0.0  ;;  %v4851_v13 = vcombine.high %v2818_v11, %v2830_v12  ;;  %v4850_v14 = vcombine.low %v2818_v11, %v2830_v12  ;;  %v2794_v15 = vld [vmem:[%s7316_s15 + $0x3c8] sm:$0xff] }
 0x196   :  { %v2686_v5 = vld [vmem:[%s7316_s15 + $0x68] sm:$0xff] }
 0x197   :  { %5251 = vmatmul.mubr.f32.vlgmr.msra.gmra.mxu0 %v2130_v16  ;;  %v2806_v16 = vld [vmem:[%s7316_s15 + $0x428] sm:$0xff] }
 0x198   :  { %5318 = vmatprep.mubr.msk.f32.mxu0 %vm5584_vm0, %v5583_v61  ;;  %5315 = vmatpush3.msk.msra.mxu0 %vm2328_vm2, %v2498_v52  ;;  %v4827_v17 = vcombine.high %v2794_v15, %v2806_v16  ;;  %v4826_v18 = vcombine.low %v2794_v15, %v2806_v16  ;;  %v2757_v52 = vld [vmem:[%s7316_s15 + $0x2a0] sm:$0xff] }
 0x199   :  { %5316 = vmatprep.subr.mxu0 %v5583_v61 }
 0x19a   :  { %5317 = vmatpush3.msra.mxu0 %v2497_v53 }
 0x19b   :  { %5321 = vmatprep.subr.mxu0 %v5583_v61 }
 0x257   :  { %v2220_v21 = vpop.f32.mrf.mxu0 }
 0x258   :  { %v2221_v22 = vadd.f32 %v4692_v20, %v2220_v21  ;;  %v2782_v20 = vld [vmem:[%s7316_s15 + $0x368] sm:$0xff] }
 0x259   :  { %v5252_v23 = vpop.f32.mrf.mxu0  ;;  %v4803_v21 = vcombine.high %v2770_v19, %v2782_v20 }
 0x25a   :  { %v2224_v24 = vmax.f32 %v2221_v22, 0.0  ;;  %v4802_v22 = vcombine.low %v2770_v19, %v2782_v20  ;;  %v2746_v23 = vld [vmem:[%s7316_s15 + $0x248] sm:$0xff]  ;;  %v2819_v20 = vld [vmem:[%s7316_s15 + $0x490] sm:$0xff] }
 0x25c   :  { %5270 = vmatmul.mubr.msk.f32.vlgmr.msra.gmra.mxu1 %vm2240_vm1, %v2224_v24  ;;  %v2758_v24 = vld [vmem:[%s7316_s15 + $0x2a8] sm:$0xff] }
 0x25d   :  { %5276 = vmatprep.mubr.msk.f32.mxu1 %vm5584_vm0, %v5583_v61  ;;  %5273 = vmatpush3.msk.msra.mxu1 %vm2328_vm2, %v2316_v25  ;;  %v4779_v25 = vcombine.high %v2746_v23, %v2758_v24 }
 0x25e   :  { %5274 = vmatprep.subr.mxu1 %v5583_v61 }
 0x25f   :  { %5275 = vmatpush3.msra.mxu1 %v2315_v26  ;;  %v4778_v26 = vcombine.low %v2746_v23, %v2758_v24  ;;  %v2820_v23 = vld [vmem:[%s7316_s15 + $0x498] sm:$0xff] }
 0x260   :  { %5279 = vmatprep.subr.mxu1 %v5583_v61  ;;  %v2832_v24 = vld [vmem:[%s7316_s15 + $0x4f8] sm:$0xff] }
 0x31c   :  { %v2310_v28 = vpop.f32.mrf.mxu1 }
 0x31d   :  { %v2311_v29 = vadd.f32 %v4693_v27, %v2310_v28  ;;  %v2722_v27 = vld [vmem:[%s7316_s15 + $0x188] sm:$0xff] }
 0x31e   :  { %v5271_v30 = vpop.f32.mrf.mxu1  ;;  %v2734_v28 = vld [vmem:[%s7316_s15 + $0x1e8] sm:$0xff] }
 0x31f   :  { %v2314_v31 = vmax.f32 %v2311_v29, 0.0  ;;  %v4755_v29 = vcombine.high %v2722_v27, %v2734_v28  ;;  %v4754_v30 = vcombine.low %v2722_v27, %v2734_v28  ;;  %v4855_v28 = vcombine.high %v2820_v23, %v2832_v24 }
 0x321   :  { %5277 = vmatmul.mubr.msk.f32.vlgmr.msra.gmra.mxu1 %vm2324_vm3, %v2314_v31  ;;  %v2698_v31 = vld [vmem:[%s7316_s15 + $0xc8] sm:$0xff] }
 0x322   :  { %5280 = vmatpush3.msra.mxu1 %v2418_v32  ;;  %5311 = vmatprep.mubr.msk.f32.mxu1 %vm5584_vm0, %v5583_v61  ;;  %v2710_v32 = vld [vmem:[%s7316_s15 + $0x128] sm:$0xff] }
 0x323   :  { %5281 = vmatprep.subr.mxu1 %v5583_v61 }
 0x324   :  { %5282 = vmatpush3.msra.mxu1 %v2417_v33  ;;  %v4731_v33 = vcombine.high %v2698_v31, %v2710_v32 }
 0x325   :  { %5283 = vmatprep.subr.mxu1 %v5583_v61 }
 0x326   :  { %5284 = vmatpush3.msra.mxu1 %v2416_v34  ;;  %v4730_v34 = vcombine.low %v2698_v31, %v2710_v32  ;;  %v2796_v31 = vld [vmem:[%s7316_s15 + $0x3d8] sm:$0xff] }
 0x327   :  { %5285 = vmatprep.subr.mxu1 %v5583_v61  ;;  %v2808_v32 = vld [vmem:[%s7316_s15 + $0x438] sm:$0xff] }
 0x328   :  { %5286 = vmatpush3.msra.mxu1 %v2415_v35  ;;  %v4699_v35 = vld [vmem:[%s7317_s12] ss:$0 sm:$0xff] }
 0x329   :  { %5287 = vmatprep.subr.mxu1 %v5583_v61 }
 0x32a   :  { %5288 = vmatpush3.msra.mxu1 %v2414_v36 }
 0x32b   :  { %5289 = vmatprep.subr.mxu1 %v5583_v61 }
 0x32c   :  { %5290 = vmatpush3.msra.mxu1 %v2413_v37  ;;  %v2817_v37 = vld [vmem:[%s7316_s15 + $0x480] sm:$0xff] }
 0x32d   :  { %5291 = vmatprep.subr.mxu1 %v5583_v61 }
 0x32e   :  { %5292 = vmatpush3.msra.mxu1 %v2412_v38  ;;  %v2829_v38 = vld [vmem:[%s7316_s15 + $0x4e0] sm:$0xff] }
 0x32f   :  { %5293 = vmatprep.subr.mxu1 %v5583_v61 }
 0x330   :  { %5294 = vmatpush3.msra.mxu1 %v2411_v39 }
 0x331   :  { %5295 = vmatprep.subr.mxu1 %v5583_v61 }
 0x332   :  { %5296 = vmatpush3.msra.mxu1 %v2410_v40 }
 0x333   :  { %5297 = vmatprep.subr.mxu1 %v5583_v61 }
 0x334   :  { %5298 = vmatpush3.msra.mxu1 %v2409_v41 }
 0x335   :  { %5299 = vmatprep.subr.mxu1 %v5583_v61 }
 0x336   :  { %5300 = vmatpush3.msra.mxu1 %v2408_v42  ;;  %v4849_v42 = vcombine.high %v2817_v37, %v2829_v38 }
 0x337   :  { %5301 = vmatprep.subr.mxu1 %v5583_v61 }
 0x338   :  { %5302 = vmatpush3.msra.mxu1 %v2407_v43  ;;  %v2793_v43 = vld [vmem:[%s7316_s15 + $0x3c0] sm:$0xff] }
 0x339   :  { %5303 = vmatprep.subr.mxu1 %v5583_v61 }
 0x33a   :  { %5304 = vmatpush3.msra.mxu1 %v2406_v44  ;;  %v2805_v44 = vld [vmem:[%s7316_s15 + $0x420] sm:$0xff] }
 0x33b   :  { %5305 = vmatprep.subr.mxu1 %v5583_v61 }
 0x33c   :  { %5306 = vmatpush3.msra.mxu1 %v2405_v45  ;;  %v4848_v45 = vcombine.low %v2817_v37, %v2829_v38  ;;  %v2771_v37 = vld [vmem:[%s7316_s15 + $0x310] sm:$0xff] }
 0x33d   :  { %5307 = vmatprep.subr.mxu1 %v5583_v61  ;;  %v2783_v38 = vld [vmem:[%s7316_s15 + $0x370] sm:$0xff] }
 0x33e   :  { %5308 = vmatpush3.msra.mxu1 %v2404_v46  ;;  %v4825_v46 = vcombine.high %v2793_v43, %v2805_v44 }
 0x33f   :  { %5309 = vmatprep.subr.mxu1 %v5583_v61 }
 0x340   :  { %5310 = vmatpush3.msra.mxu1 %v2403_v47  ;;  %v2769_v47 = vld [vmem:[%s7316_s15 + $0x300] sm:$0xff] }
 0x341   :  { %3992 = vmatprep.subr.bf16.mxu1 %v4875_v10  ;;  %v2844_v10 = vld [vmem:[%s7316_s15 + $0x558] sm:$0xff] }
 0x3e1   :  { %v2398_v49 = vpop.f32.mrf.mxu1 }
 0x3e2   :  { %v2399_v50 = vadd.f32 %v4695_v48, %v2398_v49  ;;  %v2781_v48 = vld [vmem:[%s7316_s15 + $0x360] sm:$0xff]  ;;  %v4824_v49 = vcombine.low %v2793_v43, %v2805_v44  ;;  %v4805_v43 = vcombine.high %v2771_v37, %v2783_v38 }
 0x3e3   :  { %v5278_v51 = vpop.f32.mrf.mxu1  ;;  %v4800_v53 = vcombine.low %v2769_v47, %v2781_v48 }
 0x3e4   :  { %2402 = vst [vmem:[%s7312_s18] sm:$0xff] %v2399_v50  ;;  %5312 = vmatmul.mubr.f32.vlgmr.msra.gmra.mxu1 %v2399_v50  ;;  %v4801_v50 = vcombine.high %v2769_v47, %v2781_v48  ;;  %v2745_v51 = vld [vmem:[%s7316_s15 + $0x240] sm:$0xff]  ;;  %v2748_v47 = vld [vmem:[%s7316_s15 + $0x258] sm:$0xff] }
 0x3e5   :  { %v2760_v48 = vld [vmem:[%s7316_s15 + $0x2b8] sm:$0xff] }
 0x4a4   :  { %v2492_v55 = vpop.f32.mrf.mxu1 }
 0x4a5   :  { %v2493_v56 = vadd.f32 %v4698_v54, %v2492_v55  ;;  %v4777_v54 = vcombine.high %v2745_v51, %v2757_v52  ;;  %v2721_v55 = vld [vmem:[%s7316_s15 + $0x180] sm:$0xff] }
 0x4a6   :  { %v5313_v57 = vpop.f32.mrf.mxu1 }
 0x4a7   :  { %v2496_v58 = vmax.f32 %v2493_v56, 0.0  ;;  %v2733_v56 = vld [vmem:[%s7316_s15 + $0x1e0] sm:$0xff]  ;;  %v4776_v57 = vcombine.low %v2745_v51, %v2757_v52  ;;  %v4783_v52 = vcombine.high %v2748_v47, %v2760_v48 }
 0x4a9   :  { %5319 = vmatmul.mubr.msk.f32.vlgmr.msra.gmra.mxu0 %vm2324_vm3, %v2496_v58  ;;  %v4753_v58 = vcombine.high %v2721_v55, %v2733_v56 }
 0x4aa   :  { %5322 = vmatpush3.msra.mxu0 %v2590_v59  ;;  %5337 = vmatprep.mubr.msk.f32.mxu0 %vm5584_vm0, %v5583_v61  ;;  %v2697_v59 = vld [vmem:[%s7316_s15 + $0xc0] sm:$0xff] }
 0x4ab   :  { %5323 = vmatprep.subr.mxu0 %v5583_v61 }
 0x4ac   :  { %5324 = vmatpush3.msra.mxu0 %v2589_v60  ;;  %v2709_v60 = vld [vmem:[%s7316_s15 + $0x120] sm:$0xff] }
 0x4ad   :  { %5325 = vmatprep.subr.mxu0 %v5583_v61 }
 0x4ae   :  { %5326 = vmatpush3.msra.mxu0 %v2588_v62  ;;  %v4752_v62 = vcombine.low %v2721_v55, %v2733_v56  ;;  %v2724_v55 = vld [vmem:[%s7316_s15 + $0x198] sm:$0xff] }
 0x4af   :  { %5327 = vmatprep.subr.mxu0 %v5583_v61  ;;  %v2736_v56 = vld [vmem:[%s7316_s15 + $0x1f8] sm:$0xff] }
 0x4b0   :  { %5328 = vmatpush3.msra.mxu0 %v2587_v63  ;;  %v4729_v63 = vcombine.high %v2697_v59, %v2709_v60 }
 0x4b1   :  { %5329 = vmatprep.subr.mxu0 %v5583_v61 }
 0x4b2   :  { %5330 = vmatpush3.msra.mxu0 %v2586_v0  ;;  %v4728_v0 = vcombine.low %v2697_v59, %v2709_v60  ;;  %v4759_v60 = vcombine.high %v2724_v55, %v2736_v56 }
 0x4b3   :  { %5331 = vmatprep.subr.mxu0 %v5583_v61 }
 0x4b4   :  { %5332 = vmatpush3.msra.mxu0 %v2585_v1  ;;  %v2673_v1 = vld [vmem:[%s7316_s15] sm:$0xff] }
 0x4b5   :  { %5333 = vmatprep.subr.mxu0 %v5583_v61 }
 0x4b6   :  { %5334 = vmatpush3.msra.mxu0 %v2584_v2  ;;  %v2685_v2 = vld [vmem:[%s7316_s15 + $0x60] sm:$0xff] }
 0x4b7   :  { %5335 = vmatprep.subr.mxu0 %v5583_v61  ;;  %v4874_v61 = vcombine.low %v2842_v6, %v2854_v9  ;;  %v4705_v4 = vcombine.high %v2673_v1, %v2685_v2  ;;  %v4704_v6 = vcombine.low %v2673_v1, %v2685_v2  ;;  %v2843_v9 = vld [vmem:[%s7316_s15 + $0x550] sm:$0xff]  ;;  %v2712_v1 = vld [vmem:[%s7316_s15 + $0x138] sm:$0xff] }
 0x4b8   :  { %5336 = vmatpush3.msra.mxu0 %v2583_v3  ;;  %v2674_v3 = vld [vmem:[%s7316_s15 + $0x8] sm:$0xff] }
 0x4b9   :  { %3951 = vmatprep.subr.bf16.mxu0 %v4873_v8  ;;  %3993 = vmatpush1.bf16.msra.mxu1 %v4874_v61  ;;  %v4707_v8 = vcombine.high %v2674_v3, %v2686_v5  ;;  %v2855_v61 = vld [vmem:[%s7316_s15 + $0x5b0] sm:$0xff] }
 0x4ba   :  { %3994 = vmatprep.subr.bf16.mxu1 %v4851_v13  ;;  %v4876_v11 = vcombine.low %v2843_v9, %v2855_v61  ;;  %v4877_v12 = vcombine.high %v2843_v9, %v2855_v61  ;;  %v2856_v13 = vld [vmem:[%s7316_s15 + $0x5b8] sm:$0xff] }
 0x4bb   :  { %v4878_v15 = vcombine.low %v2844_v10, %v2856_v13  ;;  %v4879_v16 = vcombine.high %v2844_v10, %v2856_v13  ;;  %v2688_v9 = vld [vmem:[%s7316_s15 + $0x78] sm:$0xff]  ;;  %v2845_v13 = vld [vmem:[%s7316_s15 + $0x560] sm:$0xff] }
 0x4bd   :  { %3995 = vmatpush1.bf16.msra.mxu1 %v4850_v14  ;;  %v5585_v14 = vmov 0  }
 0x4be   :  { %3996 = vmatprep.subr.bf16.mxu1 %v4827_v17  ;;  %4024 = vmatprep.mubr.bf16.mxu1 %v5585_v14  ;;  %v4702_v17 = vld [vmem:[%s7318_s14] ss:$0 sm:$0xff] }
 0x4c1   :  { %3997 = vmatpush1.bf16.msra.mxu1 %v4826_v18 }
 0x4c2   :  { %3998 = vmatprep.subr.bf16.mxu1 %v4803_v21 }
 0x4c5   :  { %3999 = vmatpush1.bf16.msra.mxu1 %v4802_v22  ;;  %v2831_v22 = vld [vmem:[%s7316_s15 + $0x4f0] sm:$0xff] }
 0x4c6   :  { %4000 = vmatprep.subr.bf16.mxu1 %v4779_v25  ;;  %v4853_v27 = vcombine.high %v2819_v20, %v2831_v22 }
 0x4c9   :  { %4001 = vmatpush1.bf16.msra.mxu1 %v4778_v26 }
 0x4ca   :  { %4002 = vmatprep.subr.bf16.mxu1 %v4755_v29  ;;  %v2795_v29 = vld [vmem:[%s7316_s15 + $0x3d0] sm:$0xff] }
 0x4cd   :  { %4003 = vmatpush1.bf16.msra.mxu1 %v4754_v30  ;;  %v2807_v30 = vld [vmem:[%s7316_s15 + $0x430] sm:$0xff] }
 0x4ce   :  { %4004 = vmatprep.subr.bf16.mxu1 %v4731_v33  ;;  %v4852_v33 = vcombine.low %v2819_v20, %v2831_v22  ;;  %v2821_v22 = vld [vmem:[%s7316_s15 + $0x4a0] sm:$0xff] }
 0x4d1   :  { %4005 = vmatpush1.bf16.msra.mxu1 %v4730_v34  ;;  %v4854_v34 = vcombine.low %v2820_v23, %v2832_v24  ;;  %v2833_v23 = vld [vmem:[%s7316_s15 + $0x500] sm:$0xff]  ;;  %v2822_v24 = vld [vmem:[%s7316_s15 + $0x4a8] sm:$0xff] }
 0x4d2   :  { %4006 = vmatprep.subr.bf16.mxu1 %v4707_v8  ;;  %v2676_v8 = vld [vmem:[%s7316_s15 + $0x18] sm:$0xff] }
 0x569   :  { %v2578_v36 = vpop.f32.mrf.mxu0 }
 0x56a   :  { %v2579_v39 = vadd.f32 %v4699_v35, %v2578_v36  ;;  %v4829_v35 = vcombine.high %v2795_v29, %v2807_v30  ;;  %v4831_v36 = vcombine.high %v2796_v31, %v2808_v32 }
 0x56b   :  { %v5320_v40 = vpop.f32.mrf.mxu0 }
 0x56c   :  { %v2582_v41 = vmax.f32 %v2579_v39, 0.0  ;;  %v2772_v39 = vld [vmem:[%s7316_s15 + $0x318] sm:$0xff] }
 0x56d   :  { %v2784_v40 = vld [vmem:[%s7316_s15 + $0x378] sm:$0xff] }
 0x56e   :  { %5338 = vmatmul.mubr.msk.f32.vlgmr.msra.gmra.mxu0 %vm2240_vm1, %v2582_v41  ;;  %v4828_v41 = vcombine.low %v2795_v29, %v2807_v30  ;;  %v4807_v44 = vcombine.high %v2772_v39, %v2784_v40  ;;  %v4857_v29 = vcombine.high %v2821_v22, %v2833_v23 }
 0x56f   :  { %3952 = vmatpush1.bf16.msra.mxu0 %v4872_v7  ;;  %v4706_v7 = vcombine.low %v2674_v3, %v2686_v5  ;;  %3983 = vmatprep.mubr.bf16.mxu0 %v5585_v14  ;;  %v4758_v3 = vcombine.low %v2724_v55, %v2736_v56  ;;  %v2725_v55 = vld [vmem:[%s7316_s15 + $0x1a0] sm:$0xff] }
 0x570   :  { %3953 = vmatprep.subr.bf16.mxu0 %v4849_v42  ;;  %v4830_v42 = vcombine.low %v2796_v31, %v2808_v32  ;;  %v2797_v31 = vld [vmem:[%s7316_s15 + $0x3e0] sm:$0xff] }
 0x571   :  { %4007 = vmatpush1.bf16.msra.mxu1 %v4706_v7  ;;  %v2687_v7 = vld [vmem:[%s7316_s15 + $0x70] sm:$0xff]  ;;  %v2809_v32 = vld [vmem:[%s7316_s15 + $0x440] sm:$0xff] }
 0x572   :  { %4074 = vmatprep.subr.bf16.mxu1 %v4879_v16  ;;  %v2846_v16 = vld [vmem:[%s7316_s15 + $0x568] sm:$0xff]  ;;  %v2737_v56 = vld [vmem:[%s7316_s15 + $0x200] sm:$0xff] }
 0x573   :  { %3954 = vmatpush1.bf16.msra.mxu0 %v4848_v45  ;;  %v2747_v45 = vld [vmem:[%s7316_s15 + $0x250] sm:$0xff] }
 0x574   :  { %3955 = vmatprep.subr.bf16.mxu0 %v4825_v46  ;;  %v2759_v46 = vld [vmem:[%s7316_s15 + $0x2b0] sm:$0xff] }
 0x575   :  { %v4781_v51 = vcombine.high %v2747_v45, %v2759_v46 }
 0x577   :  { %3956 = vmatpush1.bf16.msra.mxu0 %v4824_v49  ;;  %v4804_v49 = vcombine.low %v2771_v37, %v2783_v38  ;;  %v4833_v37 = vcombine.high %v2797_v31, %v2809_v32 }
 0x578   :  { %3957 = vmatprep.subr.bf16.mxu0 %v4801_v50  ;;  %v4806_v50 = vcombine.low %v2772_v39, %v2784_v40  ;;  %v2773_v39 = vld [vmem:[%s7316_s15 + $0x320] sm:$0xff] }
 0x579   :  { %v2785_v40 = vld [vmem:[%s7316_s15 + $0x380] sm:$0xff] }
 0x57b   :  { %3958 = vmatpush1.bf16.msra.mxu0 %v4800_v53  ;;  %v2723_v53 = vld [vmem:[%s7316_s15 + $0x190] sm:$0xff] }
 0x57c   :  { %3959 = vmatprep.subr.bf16.mxu0 %v4777_v54  ;;  %v2735_v54 = vld [vmem:[%s7316_s15 + $0x1f0] sm:$0xff] }
 0x57d   :  { %v4757_v59 = vcombine.high %v2723_v53, %v2735_v54  ;;  %v4756_v2 = vcombine.low %v2723_v53, %v2735_v54 }
 0x57f   :  { %3960 = vmatpush1.bf16.msra.mxu0 %v4776_v57  ;;  %v4780_v57 = vcombine.low %v2747_v45, %v2759_v46  ;;  %v4809_v45 = vcombine.high %v2773_v39, %v2785_v40 }
 0x580   :  { %3961 = vmatprep.subr.bf16.mxu0 %v4753_v58  ;;  %v4782_v58 = vcombine.low %v2748_v47, %v2760_v48  ;;  %v2749_v47 = vld [vmem:[%s7316_s15 + $0x260] sm:$0xff] }
 0x581   :  { %v2761_v48 = vld [vmem:[%s7316_s15 + $0x2c0] sm:$0xff] }
 0x582   :  { %v4785_v53 = vcombine.high %v2749_v47, %v2761_v48 }
 0x583   :  { %3962 = vmatpush1.bf16.msra.mxu0 %v4752_v62  ;;  %v2699_v62 = vld [vmem:[%s7316_s15 + $0xd0] sm:$0xff] }
 0x584   :  { %3963 = vmatprep.subr.bf16.mxu0 %v4729_v63  ;;  %v2711_v63 = vld [vmem:[%s7316_s15 + $0x130] sm:$0xff] }
 0x585   :  { %v4732_v61 = vcombine.low %v2699_v62, %v2711_v63 }
 0x587   :  { %3964 = vmatpush1.bf16.msra.mxu0 %v4728_v0  ;;  %v2700_v0 = vld [vmem:[%s7316_s15 + $0xd8] sm:$0xff] }
 0x588   :  { %3965 = vmatprep.subr.bf16.mxu0 %v4705_v4  ;;  %v4733_v4 = vcombine.high %v2699_v62, %v2711_v63  ;;  %v4735_v5 = vcombine.high %v2700_v0, %v2712_v1  ;;  %v4734_v10 = vcombine.low %v2700_v0, %v2712_v1  ;;  %v4761_v62 = vcombine.high %v2725_v55, %v2737_v56  ;;  %v2701_v0 = vld [vmem:[%s7316_s15 + $0xe0] sm:$0xff] }
 0x589   :  { %v2713_v1 = vld [vmem:[%s7316_s15 + $0x140] sm:$0xff] }
 0x58b   :  { %3966 = vmatpush1.bf16.msra.mxu0 %v4704_v6  ;;  %v2675_v6 = vld [vmem:[%s7316_s15 + $0x10] sm:$0xff] }
 0x58c   :  { %4033 = vmatprep.subr.bf16.mxu0 %v4877_v12  ;;  %v4711_v12 = vcombine.high %v2676_v8, %v2688_v9 }
 0x62e   :  { %v2667_v18 = vpop.f32.mrf.mxu0 }
 0x62f   :  { %v2668_v19 = vadd.f32 %v4702_v17, %v2667_v18  ;;  %v2858_v17 = vld [vmem:[%s7316_s15 + $0x5c8] sm:$0xff]  ;;  %v4708_v18 = vcombine.low %v2675_v6, %v2687_v7 }
 0x630   :  { %v5339_v21 = vpop.f32.mrf.mxu0 }
 0x631   :  { %v2671_v25 = vmax.f32 %v2668_v19, 0.0  ;;  %v4710_v19 = vcombine.low %v2676_v8, %v2688_v9  ;;  %v4883_v21 = vcombine.high %v2846_v16, %v2858_v17  ;;  %v2677_v8 = vld [vmem:[%s7316_s15 + $0x20] sm:$0xff] }
 0x632   :  { %v2689_v9 = vld [vmem:[%s7316_s15 + $0x80] sm:$0xff] }
 0x633   :  { %v6701_v26 = vpack.c.bf16 %v2671_v25, %v2671_v25  ;;  %v2834_v25 = vld [vmem:[%s7316_s15 + $0x508] sm:$0xff] }
 0x634   :  { %v4859_v30 = vcombine.high %v2822_v24, %v2834_v25 }
 0x635   :  { %3984 = vmatmul.mubr.bf16.vlgmr.msra.gmra.mxu0 %v6701_v26  ;;  %4025 = vmatmul.mubr.bf16.vlgmr.msra.gmra.mxu1 %v6701_v26 }
 0x636   :  { %4034 = vmatpush1.bf16.msra.mxu0 %v4876_v11  ;;  %4075 = vmatpush1.bf16.msra.mxu1 %v4878_v15  ;;  %v4709_v11 = vcombine.high %v2675_v6, %v2687_v7  ;;  %v2857_v15 = vld [vmem:[%s7316_s15 + $0x5c0] sm:$0xff]  ;;  %v4737_v6 = vcombine.high %v2701_v0, %v2713_v1 }
 0x637   :  { %4035 = vmatprep.subr.bf16.mxu0 %v4853_v27  ;;  %4076 = vmatprep.subr.bf16.mxu1 %v4855_v28  ;;  %v4881_v20 = vcombine.high %v2845_v13, %v2857_v15  ;;  %v4880_v27 = vcombine.low %v2845_v13, %v2857_v15  ;;  %v4882_v28 = vcombine.low %v2846_v16, %v2858_v17  ;;  %v2847_v16 = vld [vmem:[%s7316_s15 + $0x570] sm:$0xff] }
 0x638   :  { %4065 = vmatprep.mubr.bf16.mxu0 %v5585_v14  ;;  %4106 = vmatprep.mubr.bf16.mxu1 %v5585_v14  ;;  %v4713_v13 = vcombine.high %v2677_v8, %v2689_v9  ;;  %v2859_v17 = vld [vmem:[%s7316_s15 + $0x5d0] sm:$0xff] }
 0x63a   :  { %4036 = vmatpush1.bf16.msra.mxu0 %v4852_v33  ;;  %4077 = vmatpush1.bf16.msra.mxu1 %v4854_v34  ;;  %v2798_v33 = vld [vmem:[%s7316_s15 + $0x3e8] sm:$0xff] }
 0x63b   :  { %4037 = vmatprep.subr.bf16.mxu0 %v4829_v35  ;;  %4078 = vmatprep.subr.bf16.mxu1 %v4831_v36  ;;  %v2810_v34 = vld [vmem:[%s7316_s15 + $0x448] sm:$0xff]  ;;  %v4856_v35 = vcombine.low %v2821_v22, %v2833_v23  ;;  %v4858_v36 = vcombine.low %v2822_v24, %v2834_v25  ;;  %v4885_v22 = vcombine.high %v2847_v16, %v2859_v17  ;;  %v2823_v24 = vld [vmem:[%s7316_s15 + $0x4b0] sm:$0xff] }
 0x63c   :  { %v4835_v38 = vcombine.high %v2798_v33, %v2810_v34  ;;  %v2835_v25 = vld [vmem:[%s7316_s15 + $0x510] sm:$0xff] }
 0x63e   :  { %4038 = vmatpush1.bf16.msra.mxu0 %v4828_v41  ;;  %4079 = vmatpush1.bf16.msra.mxu1 %v4830_v42  ;;  %v2774_v41 = vld [vmem:[%s7316_s15 + $0x328] sm:$0xff] }
 0x63f   :  { %4039 = vmatprep.subr.bf16.mxu0 %v4805_v43  ;;  %4080 = vmatprep.subr.bf16.mxu1 %v4807_v44  ;;  %v2786_v42 = vld [vmem:[%s7316_s15 + $0x388] sm:$0xff]  ;;  %v4832_v43 = vcombine.low %v2797_v31, %v2809_v32  ;;  %v4834_v44 = vcombine.low %v2798_v33, %v2810_v34  ;;  %v4861_v31 = vcombine.high %v2823_v24, %v2835_v25  ;;  %v2799_v33 = vld [vmem:[%s7316_s15 + $0x3f0] sm:$0xff] }
 0x640   :  { %v4811_v46 = vcombine.high %v2774_v41, %v2786_v42  ;;  %v2811_v34 = vld [vmem:[%s7316_s15 + $0x450] sm:$0xff] }
 0x642   :  { %4040 = vmatpush1.bf16.msra.mxu0 %v4804_v49  ;;  %4081 = vmatpush1.bf16.msra.mxu1 %v4806_v50  ;;  %v2750_v49 = vld [vmem:[%s7316_s15 + $0x268] sm:$0xff] }
 0x643   :  { %4041 = vmatprep.subr.bf16.mxu0 %v4781_v51  ;;  %4082 = vmatprep.subr.bf16.mxu1 %v4783_v52  ;;  %v2762_v50 = vld [vmem:[%s7316_s15 + $0x2c8] sm:$0xff]  ;;  %v4808_v51 = vcombine.low %v2773_v39, %v2785_v40  ;;  %v4810_v52 = vcombine.low %v2774_v41, %v2786_v42  ;;  %v4837_v39 = vcombine.high %v2799_v33, %v2811_v34  ;;  %v2775_v41 = vld [vmem:[%s7316_s15 + $0x330] sm:$0xff] }
 0x644   :  { %v4787_v54 = vcombine.high %v2750_v49, %v2762_v50  ;;  %v2787_v42 = vld [vmem:[%s7316_s15 + $0x390] sm:$0xff] }
 0x646   :  { %4042 = vmatpush1.bf16.msra.mxu0 %v4780_v57  ;;  %4083 = vmatpush1.bf16.msra.mxu1 %v4782_v58  ;;  %v2726_v57 = vld [vmem:[%s7316_s15 + $0x1a8] sm:$0xff] }
 0x647   :  { %4043 = vmatprep.subr.bf16.mxu0 %v4757_v59  ;;  %4084 = vmatprep.subr.bf16.mxu1 %v4759_v60  ;;  %v2738_v58 = vld [vmem:[%s7316_s15 + $0x208] sm:$0xff]  ;;  %v4784_v59 = vcombine.low %v2749_v47, %v2761_v48  ;;  %v4786_v60 = vcombine.low %v2750_v49, %v2762_v50  ;;  %v4813_v47 = vcombine.high %v2775_v41, %v2787_v42  ;;  %v2751_v49 = vld [vmem:[%s7316_s15 + $0x270] sm:$0xff] }
 0x648   :  { %v4763_v63 = vcombine.high %v2726_v57, %v2738_v58  ;;  %v2763_v50 = vld [vmem:[%s7316_s15 + $0x2d0] sm:$0xff] }
 0x64a   :  { %4044 = vmatpush1.bf16.msra.mxu0 %v4756_v2  ;;  %4085 = vmatpush1.bf16.msra.mxu1 %v4758_v3  ;;  %v2702_v2 = vld [vmem:[%s7316_s15 + $0xe8] sm:$0xff] }
 0x64b   :  { %4045 = vmatprep.subr.bf16.mxu0 %v4733_v4  ;;  %4086 = vmatprep.subr.bf16.mxu1 %v4735_v5  ;;  %v2714_v3 = vld [vmem:[%s7316_s15 + $0x148] sm:$0xff]  ;;  %v4760_v4 = vcombine.low %v2725_v55, %v2737_v56  ;;  %v4762_v5 = vcombine.low %v2726_v57, %v2738_v58  ;;  %v4789_v55 = vcombine.high %v2751_v49, %v2763_v50  ;;  %v2727_v57 = vld [vmem:[%s7316_s15 + $0x1b0] sm:$0xff] }
 0x64c   :  { %v4739_v7 = vcombine.high %v2702_v2, %v2714_v3  ;;  %v2739_v58 = vld [vmem:[%s7316_s15 + $0x210] sm:$0xff] }
 0x64e   :  { %4046 = vmatpush1.bf16.msra.mxu0 %v4732_v61  ;;  %4087 = vmatpush1.bf16.msra.mxu1 %v4734_v10  ;;  %v2678_v61 = vld [vmem:[%s7316_s15 + $0x28] sm:$0xff] }
 0x64f   :  { %4047 = vmatprep.subr.bf16.mxu0 %v4709_v11  ;;  %4088 = vmatprep.subr.bf16.mxu1 %v4711_v12  ;;  %v2690_v10 = vld [vmem:[%s7316_s15 + $0x88] sm:$0xff]  ;;  %v4736_v11 = vcombine.low %v2701_v0, %v2713_v1  ;;  %v4738_v12 = vcombine.low %v2702_v2, %v2714_v3  ;;  %v4765_v0 = vcombine.high %v2727_v57, %v2739_v58  ;;  %v2703_v2 = vld [vmem:[%s7316_s15 + $0xf0] sm:$0xff] }
 0x650   :  { %v4715_v15 = vcombine.high %v2678_v61, %v2690_v10  ;;  %v2715_v3 = vld [vmem:[%s7316_s15 + $0x150] sm:$0xff] }
 0x652   :  { %4048 = vmatpush1.bf16.msra.mxu0 %v4708_v18  ;;  %4089 = vmatpush1.bf16.msra.mxu1 %v4710_v19  ;;  %v2848_v18 = vld [vmem:[%s7316_s15 + $0x578] sm:$0xff] }
 0x653   :  { %4115 = vmatprep.subr.bf16.mxu0 %v4881_v20  ;;  %4156 = vmatprep.subr.bf16.mxu1 %v4883_v21  ;;  %v2860_v19 = vld [vmem:[%s7316_s15 + $0x5d8] sm:$0xff]  ;;  %v4712_v20 = vcombine.low %v2677_v8, %v2689_v9  ;;  %v4714_v21 = vcombine.low %v2678_v61, %v2690_v10  ;;  %v4741_v8 = vcombine.high %v2703_v2, %v2715_v3  ;;  %v2679_v61 = vld [vmem:[%s7316_s15 + $0x30] sm:$0xff] }
 0x654   :  { %v4887_v23 = vcombine.high %v2848_v18, %v2860_v19  ;;  %v2691_v10 = vld [vmem:[%s7316_s15 + $0x90] sm:$0xff] }
 0x655   :  { %4066 = vmatmul.mubr.bf16.vlgmr.msra.gmra.mxu0 %v6701_v26  ;;  %4107 = vmatmul.mubr.bf16.vlgmr.msra.gmra.mxu1 %v6701_v26 }
 0x656   :  { %4116 = vmatpush1.bf16.msra.mxu0 %v4880_v27  ;;  %4157 = vmatpush1.bf16.msra.mxu1 %v4882_v28  ;;  %v2824_v27 = vld [vmem:[%s7316_s15 + $0x4b8] sm:$0xff] }
 0x657   :  { %4117 = vmatprep.subr.bf16.mxu0 %v4857_v29  ;;  %4158 = vmatprep.subr.bf16.mxu1 %v4859_v30  ;;  %v2836_v28 = vld [vmem:[%s7316_s15 + $0x518] sm:$0xff]  ;;  %v4884_v29 = vcombine.low %v2847_v16, %v2859_v17  ;;  %v4886_v30 = vcombine.low %v2848_v18, %v2860_v19  ;;  %v4717_v16 = vcombine.high %v2679_v61, %v2691_v10  ;;  %v2849_v18 = vld [vmem:[%s7316_s15 + $0x580] sm:$0xff] }
 0x658   :  { %4147 = vmatprep.mubr.bf16.mxu0 %v5585_v14  ;;  %4188 = vmatprep.mubr.bf16.mxu1 %v5585_v14  ;;  %v4863_v32 = vcombine.high %v2824_v27, %v2836_v28  ;;  %v2861_v19 = vld [vmem:[%s7316_s15 + $0x5e0] sm:$0xff] }
 0x65a   :  { %4118 = vmatpush1.bf16.msra.mxu0 %v4856_v35  ;;  %4159 = vmatpush1.bf16.msra.mxu1 %v4858_v36  ;;  %v2800_v35 = vld [vmem:[%s7316_s15 + $0x3f8] sm:$0xff] }
 0x65b   :  { %4119 = vmatprep.subr.bf16.mxu0 %v4833_v37  ;;  %4160 = vmatprep.subr.bf16.mxu1 %v4835_v38  ;;  %v2812_v36 = vld [vmem:[%s7316_s15 + $0x458] sm:$0xff]  ;;  %v4860_v37 = vcombine.low %v2823_v24, %v2835_v25  ;;  %v4862_v38 = vcombine.low %v2824_v27, %v2836_v28  ;;  %v4889_v24 = vcombine.high %v2849_v18, %v2861_v19  ;;  %v2825_v27 = vld [vmem:[%s7316_s15 + $0x4c0] sm:$0xff] }
 0x65c   :  { %v4839_v40 = vcombine.high %v2800_v35, %v2812_v36  ;;  %v2837_v28 = vld [vmem:[%s7316_s15 + $0x520] sm:$0xff] }
 0x65e   :  { %4120 = vmatpush1.bf16.msra.mxu0 %v4832_v43  ;;  %4161 = vmatpush1.bf16.msra.mxu1 %v4834_v44  ;;  %v2776_v43 = vld [vmem:[%s7316_s15 + $0x338] sm:$0xff] }
 0x65f   :  { %4121 = vmatprep.subr.bf16.mxu0 %v4809_v45  ;;  %4162 = vmatprep.subr.bf16.mxu1 %v4811_v46  ;;  %v2788_v44 = vld [vmem:[%s7316_s15 + $0x398] sm:$0xff]  ;;  %v4836_v45 = vcombine.low %v2799_v33, %v2811_v34  ;;  %v4838_v46 = vcombine.low %v2800_v35, %v2812_v36  ;;  %v4865_v33 = vcombine.high %v2825_v27, %v2837_v28  ;;  %v2801_v35 = vld [vmem:[%s7316_s15 + $0x400] sm:$0xff] }
 0x660   :  { %v4815_v48 = vcombine.high %v2776_v43, %v2788_v44  ;;  %v2813_v36 = vld [vmem:[%s7316_s15 + $0x460] sm:$0xff] }
 0x662   :  { %4122 = vmatpush1.bf16.msra.mxu0 %v4808_v51  ;;  %4163 = vmatpush1.bf16.msra.mxu1 %v4810_v52  ;;  %v2752_v51 = vld [vmem:[%s7316_s15 + $0x278] sm:$0xff] }
 0x663   :  { %4123 = vmatprep.subr.bf16.mxu0 %v4785_v53  ;;  %4164 = vmatprep.subr.bf16.mxu1 %v4787_v54  ;;  %v2764_v52 = vld [vmem:[%s7316_s15 + $0x2d8] sm:$0xff]  ;;  %v4812_v53 = vcombine.low %v2775_v41, %v2787_v42  ;;  %v4814_v54 = vcombine.low %v2776_v43, %v2788_v44  ;;  %v4841_v41 = vcombine.high %v2801_v35, %v2813_v36  ;;  %v2777_v43 = vld [vmem:[%s7316_s15 + $0x340] sm:$0xff] }
 0x664   :  { %v4791_v56 = vcombine.high %v2752_v51, %v2764_v52  ;;  %v2789_v44 = vld [vmem:[%s7316_s15 + $0x3a0] sm:$0xff] }
 0x666   :  { %4124 = vmatpush1.bf16.msra.mxu0 %v4784_v59  ;;  %4165 = vmatpush1.bf16.msra.mxu1 %v4786_v60  ;;  %v2728_v59 = vld [vmem:[%s7316_s15 + $0x1b8] sm:$0xff] }
 0x667   :  { %4125 = vmatprep.subr.bf16.mxu0 %v4761_v62  ;;  %4166 = vmatprep.subr.bf16.mxu1 %v4763_v63  ;;  %v2740_v60 = vld [vmem:[%s7316_s15 + $0x218] sm:$0xff]  ;;  %v4788_v62 = vcombine.low %v2751_v49, %v2763_v50  ;;  %v4790_v63 = vcombine.low %v2752_v51, %v2764_v52  ;;  %v4817_v49 = vcombine.high %v2777_v43, %v2789_v44  ;;  %v2753_v51 = vld [vmem:[%s7316_s15 + $0x280] sm:$0xff] }
 0x668   :  { %v4767_v1 = vcombine.high %v2728_v59, %v2740_v60  ;;  %v2765_v52 = vld [vmem:[%s7316_s15 + $0x2e0] sm:$0xff] }
 0x66a   :  { %4126 = vmatpush1.bf16.msra.mxu0 %v4760_v4  ;;  %4167 = vmatpush1.bf16.msra.mxu1 %v4762_v5  ;;  %v2704_v4 = vld [vmem:[%s7316_s15 + $0xf8] sm:$0xff] }
 0x66b   :  { %4127 = vmatprep.subr.bf16.mxu0 %v4737_v6  ;;  %4168 = vmatprep.subr.bf16.mxu1 %v4739_v7  ;;  %v2716_v5 = vld [vmem:[%s7316_s15 + $0x158] sm:$0xff]  ;;  %v4764_v6 = vcombine.low %v2727_v57, %v2739_v58  ;;  %v4766_v7 = vcombine.low %v2728_v59, %v2740_v60  ;;  %v4793_v57 = vcombine.high %v2753_v51, %v2765_v52  ;;  %v2729_v59 = vld [vmem:[%s7316_s15 + $0x1c0] sm:$0xff] }
 0x66c   :  { %v4743_v9 = vcombine.high %v2704_v4, %v2716_v5  ;;  %v2741_v60 = vld [vmem:[%s7316_s15 + $0x220] sm:$0xff] }
 0x66e   :  { %4128 = vmatpush1.bf16.msra.mxu0 %v4736_v11  ;;  %4169 = vmatpush1.bf16.msra.mxu1 %v4738_v12  ;;  %v2680_v11 = vld [vmem:[%s7316_s15 + $0x38] sm:$0xff] }
 0x66f   :  { %4129 = vmatprep.subr.bf16.mxu0 %v4713_v13  ;;  %4170 = vmatprep.subr.bf16.mxu1 %v4715_v15  ;;  %v2692_v12 = vld [vmem:[%s7316_s15 + $0x98] sm:$0xff]  ;;  %v4740_v13 = vcombine.low %v2703_v2, %v2715_v3  ;;  %v4742_v15 = vcombine.low %v2704_v4, %v2716_v5  ;;  %v4769_v2 = vcombine.high %v2729_v59, %v2741_v60  ;;  %v2705_v4 = vld [vmem:[%s7316_s15 + $0x100] sm:$0xff] }
 0x670   :  { %v4719_v17 = vcombine.high %v2680_v11, %v2692_v12  ;;  %v2717_v5 = vld [vmem:[%s7316_s15 + $0x160] sm:$0xff] }
 0x672   :  { %4130 = vmatpush1.bf16.msra.mxu0 %v4712_v20  ;;  %4171 = vmatpush1.bf16.msra.mxu1 %v4714_v21  ;;  %v2850_v20 = vld [vmem:[%s7316_s15 + $0x588] sm:$0xff] }
 0x673   :  { %4197 = vmatprep.subr.bf16.mxu0 %v4885_v22  ;;  %4238 = vmatprep.subr.bf16.mxu1 %v4887_v23  ;;  %v2862_v21 = vld [vmem:[%s7316_s15 + $0x5e8] sm:$0xff]  ;;  %v4716_v22 = vcombine.low %v2679_v61, %v2691_v10  ;;  %v4718_v23 = vcombine.low %v2680_v11, %v2692_v12  ;;  %v4745_v61 = vcombine.high %v2705_v4, %v2717_v5  ;;  %v2681_v11 = vld [vmem:[%s7316_s15 + $0x40] sm:$0xff] }
 0x674   :  { %v4891_v25 = vcombine.high %v2850_v20, %v2862_v21  ;;  %v2693_v12 = vld [vmem:[%s7316_s15 + $0xa0] sm:$0xff] }
 0x675   :  { %4148 = vmatmul.mubr.bf16.vlgmr.msra.gmra.mxu0 %v6701_v26  ;;  %4189 = vmatmul.mubr.bf16.vlgmr.msra.gmra.mxu1 %v6701_v26 }
 0x676   :  { %4198 = vmatpush1.bf16.msra.mxu0 %v4884_v29  ;;  %4239 = vmatpush1.bf16.msra.mxu1 %v4886_v30  ;;  %v2826_v29 = vld [vmem:[%s7316_s15 + $0x4c8] sm:$0xff] }
 0x677   :  { %4199 = vmatprep.subr.bf16.mxu0 %v4861_v31  ;;  %4240 = vmatprep.subr.bf16.mxu1 %v4863_v32  ;;  %v2838_v30 = vld [vmem:[%s7316_s15 + $0x528] sm:$0xff]  ;;  %v4888_v31 = vcombine.low %v2849_v18, %v2861_v19  ;;  %v4890_v32 = vcombine.low %v2850_v20, %v2862_v21  ;;  %v4721_v18 = vcombine.high %v2681_v11, %v2693_v12  ;;  %v2851_v20 = vld [vmem:[%s7316_s15 + $0x590] sm:$0xff] }
 0x678   :  { %4229 = vmatprep.mubr.bf16.mxu0 %v5585_v14  ;;  %4270 = vmatprep.mubr.bf16.mxu1 %v5585_v14  ;;  %v4867_v34 = vcombine.high %v2826_v29, %v2838_v30  ;;  %v2863_v21 = vld [vmem:[%s7316_s15 + $0x5f0] sm:$0xff] }
 0x67a   :  { %4200 = vmatpush1.bf16.msra.mxu0 %v4860_v37  ;;  %4241 = vmatpush1.bf16.msra.mxu1 %v4862_v38  ;;  %v2802_v37 = vld [vmem:[%s7316_s15 + $0x408] sm:$0xff] }
 0x67b   :  { %4201 = vmatprep.subr.bf16.mxu0 %v4837_v39  ;;  %4242 = vmatprep.subr.bf16.mxu1 %v4839_v40  ;;  %v2814_v38 = vld [vmem:[%s7316_s15 + $0x468] sm:$0xff]  ;;  %v4864_v39 = vcombine.low %v2825_v27, %v2837_v28  ;;  %v4866_v40 = vcombine.low %v2826_v29, %v2838_v30  ;;  %v4893_v27 = vcombine.high %v2851_v20, %v2863_v21  ;;  %v2827_v29 = vld [vmem:[%s7316_s15 + $0x4d0] sm:$0xff] }
 0x67c   :  { %v4843_v42 = vcombine.high %v2802_v37, %v2814_v38  ;;  %v2839_v30 = vld [vmem:[%s7316_s15 + $0x530] sm:$0xff] }
 0x67e   :  { %4202 = vmatpush1.bf16.msra.mxu0 %v4836_v45  ;;  %4243 = vmatpush1.bf16.msra.mxu1 %v4838_v46  ;;  %v2778_v45 = vld [vmem:[%s7316_s15 + $0x348] sm:$0xff] }
 0x67f   :  { %4203 = vmatprep.subr.bf16.mxu0 %v4813_v47  ;;  %4244 = vmatprep.subr.bf16.mxu1 %v4815_v48  ;;  %v2790_v46 = vld [vmem:[%s7316_s15 + $0x3a8] sm:$0xff]  ;;  %v4840_v47 = vcombine.low %v2801_v35, %v2813_v36  ;;  %v4842_v48 = vcombine.low %v2802_v37, %v2814_v38  ;;  %v4869_v35 = vcombine.high %v2827_v29, %v2839_v30  ;;  %v2803_v37 = vld [vmem:[%s7316_s15 + $0x410] sm:$0xff] }
 0x680   :  { %v4819_v50 = vcombine.high %v2778_v45, %v2790_v46  ;;  %v2815_v38 = vld [vmem:[%s7316_s15 + $0x470] sm:$0xff] }
 0x682   :  { %4204 = vmatpush1.bf16.msra.mxu0 %v4812_v53  ;;  %4245 = vmatpush1.bf16.msra.mxu1 %v4814_v54  ;;  %v2754_v53 = vld [vmem:[%s7316_s15 + $0x288] sm:$0xff] }
 0x683   :  { %4205 = vmatprep.subr.bf16.mxu0 %v4789_v55  ;;  %4246 = vmatprep.subr.bf16.mxu1 %v4791_v56  ;;  %v2766_v54 = vld [vmem:[%s7316_s15 + $0x2e8] sm:$0xff]  ;;  %v4816_v55 = vcombine.low %v2777_v43, %v2789_v44  ;;  %v4818_v56 = vcombine.low %v2778_v45, %v2790_v46  ;;  %v4845_v43 = vcombine.high %v2803_v37, %v2815_v38  ;;  %v2779_v45 = vld [vmem:[%s7316_s15 + $0x350] sm:$0xff] }
 0x684   :  { %v4795_v58 = vcombine.high %v2754_v53, %v2766_v54  ;;  %v2791_v46 = vld [vmem:[%s7316_s15 + $0x3b0] sm:$0xff] }
 0x686   :  { %4206 = vmatpush1.bf16.msra.mxu0 %v4788_v62  ;;  %4247 = vmatpush1.bf16.msra.mxu1 %v4790_v63  ;;  %v2730_v62 = vld [vmem:[%s7316_s15 + $0x1c8] sm:$0xff] }
 0x687   :  { %4207 = vmatprep.subr.bf16.mxu0 %v4765_v0  ;;  %4248 = vmatprep.subr.bf16.mxu1 %v4767_v1  ;;  %v2742_v63 = vld [vmem:[%s7316_s15 + $0x228] sm:$0xff]  ;;  %v4792_v0 = vcombine.low %v2753_v51, %v2765_v52  ;;  %v4794_v1 = vcombine.low %v2754_v53, %v2766_v54  ;;  %v4821_v51 = vcombine.high %v2779_v45, %v2791_v46  ;;  %v2755_v53 = vld [vmem:[%s7316_s15 + $0x290] sm:$0xff] }
 0x688   :  { %v4771_v3 = vcombine.high %v2730_v62, %v2742_v63  ;;  %v2767_v54 = vld [vmem:[%s7316_s15 + $0x2f0] sm:$0xff] }
 0x68a   :  { %4208 = vmatpush1.bf16.msra.mxu0 %v4764_v6  ;;  %4249 = vmatpush1.bf16.msra.mxu1 %v4766_v7  ;;  %v2706_v6 = vld [vmem:[%s7316_s15 + $0x108] sm:$0xff] }
 0x68b   :  { %4209 = vmatprep.subr.bf16.mxu0 %v4741_v8  ;;  %4250 = vmatprep.subr.bf16.mxu1 %v4743_v9  ;;  %v2718_v7 = vld [vmem:[%s7316_s15 + $0x168] sm:$0xff]  ;;  %v4768_v8 = vcombine.low %v2729_v59, %v2741_v60  ;;  %v4770_v9 = vcombine.low %v2730_v62, %v2742_v63  ;;  %v2731_v60 = vld [vmem:[%s7316_s15 + $0x1d0] sm:$0xff]  ;;  %v2732_v63 = vld [vmem:[%s7316_s15 + $0x1d8] sm:$0xff] }
 0x68c   :  { %v4747_v10 = vcombine.high %v2706_v6, %v2718_v7  ;;  %v2743_v62 = vld [vmem:[%s7316_s15 + $0x230] sm:$0xff] }
 0x68e   :  { %4210 = vmatpush1.bf16.msra.mxu0 %v4740_v13  ;;  %4251 = vmatpush1.bf16.msra.mxu1 %v4742_v15  ;;  %v2682_v13 = vld [vmem:[%s7316_s15 + $0x48] sm:$0xff] }
 0x68f   :  { %4211 = vmatprep.subr.bf16.mxu0 %v4717_v16  ;;  %4252 = vmatprep.subr.bf16.mxu1 %v4719_v17  ;;  %v2694_v15 = vld [vmem:[%s7316_s15 + $0xa8] sm:$0xff]  ;;  %v4744_v16 = vcombine.low %v2705_v4, %v2717_v5  ;;  %v4746_v17 = vcombine.low %v2706_v6, %v2718_v7  ;;  %v2707_v5 = vld [vmem:[%s7316_s15 + $0x110] sm:$0xff]  ;;  %v2708_v7 = vld [vmem:[%s7316_s15 + $0x118] sm:$0xff] }
 0x690   :  { %v4723_v19 = vcombine.high %v2682_v13, %v2694_v15  ;;  %v2719_v6 = vld [vmem:[%s7316_s15 + $0x170] sm:$0xff] }
 0x692   :  { %4212 = vmatpush1.bf16.msra.mxu0 %v4716_v22  ;;  %4253 = vmatpush1.bf16.msra.mxu1 %v4718_v23  ;;  %v2852_v22 = vld [vmem:[%s7316_s15 + $0x598] sm:$0xff] }
 0x693   :  { %4279 = vmatprep.subr.bf16.mxu0 %v4889_v24  ;;  %4320 = vmatprep.subr.bf16.mxu1 %v4891_v25  ;;  %v2864_v23 = vld [vmem:[%s7316_s15 + $0x5f8] sm:$0xff]  ;;  %v4720_v24 = vcombine.low %v2681_v11, %v2693_v12  ;;  %v4722_v25 = vcombine.low %v2682_v13, %v2694_v15  ;;  %v2683_v12 = vld [vmem:[%s7316_s15 + $0x50] sm:$0xff] }
 0x694   :  { %v4895_v28 = vcombine.high %v2852_v22, %v2864_v23  ;;  %v2695_v13 = vld [vmem:[%s7316_s15 + $0xb0] sm:$0xff]  ;;  %v2684_v15 = vld [vmem:[%s7316_s15 + $0x58] sm:$0xff] }
 0x695   :  { %4230 = vmatmul.mubr.bf16.vlgmr.msra.gmra.mxu0 %v6701_v26  ;;  %4271 = vmatmul.mubr.bf16.vlgmr.msra.gmra.mxu1 %v6701_v26 }
 0x696   :  { %4280 = vmatpush1.bf16.msra.mxu0 %v4888_v31  ;;  %4321 = vmatpush1.bf16.msra.mxu1 %v4890_v32  ;;  %v2828_v31 = vld [vmem:[%s7316_s15 + $0x4d8] sm:$0xff] }
 0x697   :  { %4281 = vmatprep.subr.bf16.mxu0 %v4865_v33  ;;  %4322 = vmatprep.subr.bf16.mxu1 %v4867_v34  ;;  %v2840_v32 = vld [vmem:[%s7316_s15 + $0x538] sm:$0xff]  ;;  %v4892_v33 = vcombine.low %v2851_v20, %v2863_v21  ;;  %v4894_v34 = vcombine.low %v2852_v22, %v2864_v23  ;;  %v4724_v21 = vcombine.low %v2683_v12, %v2695_v13  ;;  %v2871_v23 = vlaneseq }
 0x698   :  { %4311 = vmatprep.mubr.bf16.mxu0 %v5585_v14  ;;  %4352 = vmatprep.mubr.bf16.mxu1 %v5585_v14  ;;  %v4871_v36 = vcombine.high %v2828_v31, %v2840_v32 }
 0x69a   :  { %4282 = vmatpush1.bf16.msra.mxu0 %v4864_v39  ;;  %4323 = vmatpush1.bf16.msra.mxu1 %v4866_v40  ;;  %v2804_v39 = vld [vmem:[%s7316_s15 + $0x418] sm:$0xff] }
 0x69b   :  { %4283 = vmatprep.subr.bf16.mxu0 %v4841_v41  ;;  %4324 = vmatprep.subr.bf16.mxu1 %v4843_v42  ;;  %v2816_v40 = vld [vmem:[%s7316_s15 + $0x478] sm:$0xff]  ;;  %v4868_v41 = vcombine.low %v2827_v29, %v2839_v30  ;;  %v4870_v42 = vcombine.low %v2828_v31, %v2840_v32 }
 0x69c   :  { %v4847_v44 = vcombine.high %v2804_v39, %v2816_v40 }
 0x69e   :  { %4284 = vmatpush1.bf16.msra.mxu0 %v4840_v47  ;;  %4325 = vmatpush1.bf16.msra.mxu1 %v4842_v48  ;;  %v2780_v47 = vld [vmem:[%s7316_s15 + $0x358] sm:$0xff] }
 0x69f   :  { %4285 = vmatprep.subr.bf16.mxu0 %v4817_v49  ;;  %4326 = vmatprep.subr.bf16.mxu1 %v4819_v50  ;;  %v2792_v48 = vld [vmem:[%s7316_s15 + $0x3b8] sm:$0xff]  ;;  %v4844_v49 = vcombine.low %v2803_v37, %v2815_v38  ;;  %v4846_v50 = vcombine.low %v2804_v39, %v2816_v40 }
 0x6a0   :  { %v4823_v52 = vcombine.high %v2780_v47, %v2792_v48 }
 0x6a2   :  { %4286 = vmatpush1.bf16.msra.mxu0 %v4816_v55  ;;  %4327 = vmatpush1.bf16.msra.mxu1 %v4818_v56  ;;  %v2768_v55 = vld [vmem:[%s7316_s15 + $0x2f8] sm:$0xff]  ;;  %v4820_v56 = vcombine.low %v2779_v45, %v2791_v46 }
 0x6a3   :  { %4287 = vmatprep.subr.bf16.mxu0 %v4793_v57  ;;  %4328 = vmatprep.subr.bf16.mxu1 %v4795_v58  ;;  %v4822_v57 = vcombine.low %v2780_v47, %v2792_v48  ;;  %v4797_v58 = vcombine.high %v2755_v53, %v2767_v54 }
 0x6a6   :  { %4288 = vmatpush1.bf16.msra.mxu0 %v4792_v0  ;;  %4329 = vmatpush1.bf16.msra.mxu1 %v4794_v1  ;;  %v2744_v0 = vld [vmem:[%s7316_s15 + $0x238] sm:$0xff]  ;;  %v4796_v1 = vcombine.low %v2755_v53, %v2767_v54 }
 0x6a7   :  { %4289 = vmatprep.subr.bf16.mxu0 %v4769_v2  ;;  %4330 = vmatprep.subr.bf16.mxu1 %v4771_v3  ;;  %v4773_v3 = vcombine.high %v2731_v60, %v2743_v62  ;;  %v4775_v4 = vcombine.high %v2732_v63, %v2744_v0 }
 0x6aa   :  { %4290 = vmatpush1.bf16.msra.mxu0 %v4768_v8  ;;  %4331 = vmatpush1.bf16.msra.mxu1 %v4770_v9  ;;  %v2720_v8 = vld [vmem:[%s7316_s15 + $0x178] sm:$0xff]  ;;  %v4772_v9 = vcombine.low %v2731_v60, %v2743_v62 }
 0x6ab   :  { %4291 = vmatprep.subr.bf16.mxu0 %v4745_v61  ;;  %4332 = vmatprep.subr.bf16.mxu1 %v4747_v10  ;;  %v4774_v61 = vcombine.low %v2732_v63, %v2744_v0  ;;  %v4749_v10 = vcombine.high %v2707_v5, %v2719_v6  ;;  %v4751_v11 = vcombine.high %v2708_v7, %v2720_v8 }
 0x6ae   :  { %4292 = vmatpush1.bf16.msra.mxu0 %v4744_v16  ;;  %4333 = vmatpush1.bf16.msra.mxu1 %v4746_v17  ;;  %v2696_v16 = vld [vmem:[%s7316_s15 + $0xb8] sm:$0xff]  ;;  %v4748_v17 = vcombine.low %v2707_v5, %v2719_v6 }
 0x6af   :  { %4293 = vmatprep.subr.bf16.mxu0 %v4721_v18  ;;  %4334 = vmatprep.subr.bf16.mxu1 %v4723_v19  ;;  %v4750_v18 = vcombine.low %v2708_v7, %v2720_v8  ;;  %v4725_v19 = vcombine.high %v2683_v12, %v2695_v13  ;;  %v4727_v20 = vcombine.high %v2684_v15, %v2696_v16 }
 0x6b0   :  { %v4726_v22 = vcombine.low %v2684_v15, %v2696_v16 }
 0x6b2   :  { %4294 = vmatpush1.bf16.msra.mxu0 %v4720_v24  ;;  %4335 = vmatpush1.bf16.msra.mxu1 %v4722_v25  ;;  %v2872_v24 = vshrl.u32 %v2871_v23, 7 }
 0x6b3   :  { %4361 = vmatprep.subr.bf16.mxu0 %v4893_v27  ;;  %4402 = vmatprep.subr.bf16.mxu1 %v4895_v28  ;;  %v2865_v28 = vld [vmem:[%s7319_s16] sm:$0xff] }
 0x6b4   :  { %v7181_v25 = vsub.s32 0, %v2872_v24  ;;  %v7183_v27 = vsub.s32 2, %v2872_v24  ;;  %v7188_v29 = vsub.s32 1, %v2872_v24  ;;  %v7190_v30 = vsub.s32 3, %v2872_v24 }
 0x6b5   :  { %4312 = vmatmul.mubr.bf16.vlgmr.msra.gmra.mxu0 %v6701_v26  ;;  %4353 = vmatmul.mubr.bf16.vlgmr.msra.gmra.mxu1 %v6701_v26  ;;  %v7214_v53 = vsub.s32 7, %v2872_v24 }
 0x6b6   :  { %4362 = vmatpush1.bf16.msra.mxu0 %v4892_v33  ;;  %4403 = vmatpush1.bf16.msra.mxu1 %v4894_v34  ;;  %v2874_v31 = vrot.slane %v2865_v28, %v7181_v25  ;;  %v2882_v32 = vrot.slane %v2865_v28, %v7183_v27  ;;  %v2886_v33 = vrot.slane %v2865_v28, %v7190_v30 }
 0x6b7   :  { %4363 = vmatprep.subr.bf16.mxu0 %v4869_v35  ;;  %4404 = vmatprep.subr.bf16.mxu1 %v4871_v36 }
 0x6b8   :  { %4393 = vmatprep.mubr.bf16.mxu0 %v5585_v14  ;;  %4434 = vmatprep.mubr.bf16.mxu1 %v5585_v14  ;;  %v2756_v14 = vld [vmem:[%s7316_s15 + $0x298] sm:$0xff] }
 0x6b9   :  { %v4799_v59 = vcombine.high %v2756_v14, %v2768_v55  ;;  %v4798_v2 = vcombine.low %v2756_v14, %v2768_v55 }
 0x6ba   :  { %4364 = vmatpush1.bf16.msra.mxu0 %v4868_v41  ;;  %4405 = vmatpush1.bf16.msra.mxu1 %v4870_v42 }
 0x6bb   :  { %4365 = vmatprep.subr.bf16.mxu0 %v4845_v43  ;;  %4406 = vmatprep.subr.bf16.mxu1 %v4847_v44 }
 0x6be   :  { %4366 = vmatpush1.bf16.msra.mxu0 %v4844_v49  ;;  %4407 = vmatpush1.bf16.msra.mxu1 %v4846_v50  ;;  %v7208_v50 = vsub.s32 4, %v2872_v24 }
 0x6bf   :  { %4367 = vmatprep.subr.bf16.mxu0 %v4821_v51  ;;  %4408 = vmatprep.subr.bf16.mxu1 %v4823_v52  ;;  %v7210_v51 = vsub.s32 6, %v2872_v24  ;;  %v7212_v52 = vsub.s32 5, %v2872_v24 }
 0x6c0   :  { %v2890_v54 = vrot.slane %v2865_v28, %v7208_v50 }
 0x6c1   :  { %v2898_v14 = vrot.slane %v2865_v28, %v7210_v51  ;;  %v2894_v55 = vrot.slane %v2865_v28, %v7212_v52 }
 0x6c2   :  { %4368 = vmatpush1.bf16.msra.mxu0 %v4820_v56  ;;  %4409 = vmatpush1.bf16.msra.mxu1 %v4822_v57  ;;  %v2902_v56 = vrot.slane %v2865_v28, %v7214_v53 }
 0x6c3   :  { %4369 = vmatprep.subr.bf16.mxu0 %v4797_v58  ;;  %4410 = vmatprep.subr.bf16.mxu1 %v4799_v59 }
 0x6c6   :  { %4370 = vmatpush1.bf16.msra.mxu0 %v4796_v1  ;;  %4411 = vmatpush1.bf16.msra.mxu1 %v4798_v2 }
 0x6c7   :  { %4371 = vmatprep.subr.bf16.mxu0 %v4773_v3  ;;  %4412 = vmatprep.subr.bf16.mxu1 %v4775_v4 }
 0x6ca   :  { %4372 = vmatpush1.bf16.msra.mxu0 %v4772_v9  ;;  %4413 = vmatpush1.bf16.msra.mxu1 %v4774_v61  ;;  %v2866_v61 = vld [vmem:[%s7319_s16 + $0x8] sm:$0xff] }
 0x6cb   :  { %4373 = vmatprep.subr.bf16.mxu0 %v4749_v10  ;;  %4414 = vmatprep.subr.bf16.mxu1 %v4751_v11  ;;  %v2906_v10 = vrot.slane %v2866_v61, %v7181_v25  ;;  %v2914_v11 = vrot.slane %v2866_v61, %v7183_v27  ;;  %v2910_v12 = vrot.slane %v2866_v61, %v7188_v29 }
 0x6cc   :  { %v2918_v13 = vrot.slane %v2866_v61, %v7190_v30 }
 0x6ce   :  { %4374 = vmatpush1.bf16.msra.mxu0 %v4748_v17  ;;  %4415 = vmatpush1.bf16.msra.mxu1 %v4750_v18 }
 0x6cf   :  { %4375 = vmatprep.subr.bf16.mxu0 %v4725_v19  ;;  %4416 = vmatprep.subr.bf16.mxu1 %v4727_v20 }
 0x6d2   :  { %4376 = vmatpush1.bf16.msra.mxu0 %v4724_v21  ;;  %4417 = vmatpush1.bf16.msra.mxu1 %v4726_v22 }
 0x6d5   :  { %4394 = vmatmul.mubr.bf16.vlgmr.msra.gmra.mxu0 %v6701_v26  ;;  %4435 = vmatmul.mubr.bf16.vlgmr.msra.gmra.mxu1 %v6701_v26  ;;  %v2878_v26 = vrot.slane %v2865_v28, %v7188_v29 }
 0x6f5   :  { %v3985_v34 = vpop.f32.mrf.mxu0  ;;  %v4026_v35 = vpop.f32.mrf.mxu1 }
 0x6f6   :  { %v3986_v36 = vadd.f32 %v3985_v34, %v2874_v31  ;;  %v4027_v37 = vadd.f32 %v4026_v35, %v2882_v32  ;;  %v2922_v35 = vrot.slane %v2866_v61, %v7208_v50 }
 0x6f7   :  { %v3987_v38 = vpop.f32.mrf.mxu0  ;;  %v4028_v39 = vpop.f32.mrf.mxu1 }
 0x6f8   :  { %5535 = vtanh.f32 %v3986_v36  ;;  %v3988_v40 = vadd.f32 %v3987_v38, %v2878_v26  ;;  %v4029_v41 = vadd.f32 %v4028_v39, %v2886_v33  ;;  %v2930_v36 = vrot.slane %v2866_v61, %v7210_v51 }
 0x6f9   :  { %5537 = vtanh.f32 %v4027_v37  ;;  %v3989_v42 = vpop.f32.mrf.mxu0  ;;  %v4030_v43 = vpop.f32.mrf.mxu1  ;;  %v2926_v37 = vrot.slane %v2866_v61, %v7212_v52  ;;  %v2934_v38 = vrot.slane %v2866_v61, %v7214_v53 }
 0x6fa   :  { %5539 = vtanh.f32 %v3988_v40 }
 0x6fb   :  { %5541 = vtanh.f32 %v4029_v41  ;;  %v3990_v44 = vpop.f32.mrf.mxu0  ;;  %v4031_v45 = vpop.f32.mrf.mxu1 }
 0x705   :  { %v5536_v46 = vpop.eup %5535 }
 0x706   :  { %v5538_v47 = vpop.eup %5537  ;;  %4467 = vst [vmem:[%s7320_s17] sm:$0xff] %v5536_v46 }
 0x707   :  { %v5540_v48 = vpop.eup %5539  ;;  %4469 = vst [vmem:[%s7320_s17 + $0x10] sm:$0xff] %v5538_v47 }
 0x708   :  { %v5542_v49 = vpop.eup %5541  ;;  %4468 = vst [vmem:[%s7320_s17 + $0x8] sm:$0xff] %v5540_v48 }
 0x709   :  { %4470 = vst [vmem:[%s7320_s17 + $0x18] sm:$0xff] %v5542_v49 }
 0x715   :  { %v4067_v57 = vpop.f32.mrf.mxu0  ;;  %v4108_v58 = vpop.f32.mrf.mxu1 }
 0x716   :  { %v4068_v59 = vadd.f32 %v4067_v57, %v2890_v54  ;;  %v4109_v60 = vadd.f32 %v4108_v58, %v2898_v14  ;;  %v2867_v58 = vld [vmem:[%s7319_s16 + $0x10] sm:$0xff] }
 0x717   :  { %v4069_v62 = vpop.f32.mrf.mxu0  ;;  %v4110_v63 = vpop.f32.mrf.mxu1 }
 0x718   :  { %5543 = vtanh.f32 %v4068_v59  ;;  %v4070_v0 = vadd.f32 %v4069_v62, %v2894_v55  ;;  %v4111_v1 = vadd.f32 %v4110_v63, %v2902_v56  ;;  %v2938_v59 = vrot.slane %v2867_v58, %v7181_v25 }
 0x719   :  { %5545 = vtanh.f32 %v4109_v60  ;;  %v4071_v2 = vpop.f32.mrf.mxu0  ;;  %v4112_v3 = vpop.f32.mrf.mxu1  ;;  %v2946_v60 = vrot.slane %v2867_v58, %v7183_v27  ;;  %v2942_v62 = vrot.slane %v2867_v58, %v7188_v29  ;;  %v2950_v63 = vrot.slane %v2867_v58, %v7190_v30 }
 0x71a   :  { %5547 = vtanh.f32 %v4070_v0 }
 0x71b   :  { %5549 = vtanh.f32 %v4111_v1  ;;  %v4072_v4 = vpop.f32.mrf.mxu0  ;;  %v4113_v5 = vpop.f32.mrf.mxu1 }
 0x725   :  { %v5544_v6 = vpop.eup %5543 }
 0x726   :  { %v5546_v7 = vpop.eup %5545  ;;  %4471 = vst [vmem:[%s7320_s17 + $0x20] sm:$0xff] %v5544_v6 }
 0x727   :  { %v5548_v8 = vpop.eup %5547  ;;  %4473 = vst [vmem:[%s7320_s17 + $0x30] sm:$0xff] %v5546_v7 }
 0x728   :  { %v5550_v9 = vpop.eup %5549  ;;  %4472 = vst [vmem:[%s7320_s17 + $0x28] sm:$0xff] %v5548_v8 }
 0x729   :  { %4474 = vst [vmem:[%s7320_s17 + $0x38] sm:$0xff] %v5550_v9 }
 0x735   :  { %v4149_v15 = vpop.f32.mrf.mxu0  ;;  %v4190_v16 = vpop.f32.mrf.mxu1 }
 0x736   :  { %v4150_v17 = vadd.f32 %v4149_v15, %v2906_v10  ;;  %v4191_v18 = vadd.f32 %v4190_v16, %v2914_v11  ;;  %v2954_v11 = vrot.slane %v2867_v58, %v7208_v50  ;;  %v2966_v15 = vrot.slane %v2867_v58, %v7214_v53 }
 0x737   :  { %v4151_v19 = vpop.f32.mrf.mxu0  ;;  %v4192_v20 = vpop.f32.mrf.mxu1 }
 0x738   :  { %5551 = vtanh.f32 %v4150_v17  ;;  %v4152_v21 = vadd.f32 %v4151_v19, %v2910_v12  ;;  %v4193_v22 = vadd.f32 %v4192_v20, %v2918_v13  ;;  %v2962_v12 = vrot.slane %v2867_v58, %v7210_v51 }
 0x739   :  { %5553 = vtanh.f32 %v4191_v18  ;;  %v4153_v23 = vpop.f32.mrf.mxu0  ;;  %v4194_v24 = vpop.f32.mrf.mxu1  ;;  %v2958_v13 = vrot.slane %v2867_v58, %v7212_v52 }
 0x73a   :  { %5555 = vtanh.f32 %v4152_v21 }
 0x73b   :  { %5557 = vtanh.f32 %v4193_v22  ;;  %v4154_v28 = vpop.f32.mrf.mxu0  ;;  %v4195_v31 = vpop.f32.mrf.mxu1 }
 0x745   :  { %v5552_v32 = vpop.eup %5551 }
 0x746   :  { %v5554_v26 = vpop.eup %5553  ;;  %4475 = vst [vmem:[%s7320_s17 + $0x40] sm:$0xff] %v5552_v32 }
 0x747   :  { %v5556_v33 = vpop.eup %5555  ;;  %4477 = vst [vmem:[%s7320_s17 + $0x50] sm:$0xff] %v5554_v26 }
 0x748   :  { %v5558_v34 = vpop.eup %5557  ;;  %4476 = vst [vmem:[%s7320_s17 + $0x48] sm:$0xff] %v5556_v33 }
 0x749   :  { %4478 = vst [vmem:[%s7320_s17 + $0x58] sm:$0xff] %v5558_v34 }
 0x755   :  { %v4231_v39 = vpop.f32.mrf.mxu0  ;;  %v4272_v40 = vpop.f32.mrf.mxu1 }
 0x756   :  { %v4232_v41 = vadd.f32 %v4231_v39, %v2922_v35  ;;  %v4273_v42 = vadd.f32 %v4272_v40, %v2930_v36 }
 0x757   :  { %v4233_v43 = vpop.f32.mrf.mxu0  ;;  %v4274_v44 = vpop.f32.mrf.mxu1 }
 0x758   :  { %5559 = vtanh.f32 %v4232_v41  ;;  %v4234_v45 = vadd.f32 %v4233_v43, %v2926_v37  ;;  %v4275_v46 = vadd.f32 %v4274_v44, %v2934_v38 }
 0x759   :  { %5561 = vtanh.f32 %v4273_v42  ;;  %v4235_v47 = vpop.f32.mrf.mxu0  ;;  %v4276_v48 = vpop.f32.mrf.mxu1 }
 0x75a   :  { %5563 = vtanh.f32 %v4234_v45 }
 0x75b   :  { %5565 = vtanh.f32 %v4275_v46  ;;  %v4236_v49 = vpop.f32.mrf.mxu0  ;;  %v4277_v54 = vpop.f32.mrf.mxu1 }
 0x765   :  { %v5560_v14 = vpop.eup %5559 }
 0x766   :  { %v5562_v55 = vpop.eup %5561  ;;  %4479 = vst [vmem:[%s7320_s17 + $0x60] sm:$0xff] %v5560_v14 }
 0x767   :  { %v5564_v56 = vpop.eup %5563  ;;  %4481 = vst [vmem:[%s7320_s17 + $0x70] sm:$0xff] %v5562_v55 }
 0x768   :  { %v5566_v57 = vpop.eup %5565  ;;  %4480 = vst [vmem:[%s7320_s17 + $0x68] sm:$0xff] %v5564_v56 }
 0x769   :  { %4482 = vst [vmem:[%s7320_s17 + $0x78] sm:$0xff] %v5566_v57 }
 0x775   :  { %v4313_v0 = vpop.f32.mrf.mxu0  ;;  %v4354_v1 = vpop.f32.mrf.mxu1 }
 0x776   :  { %v4314_v2 = vadd.f32 %v4313_v0, %v2938_v59  ;;  %v4355_v3 = vadd.f32 %v4354_v1, %v2946_v60 }
 0x777   :  { %v4315_v4 = vpop.f32.mrf.mxu0  ;;  %v4356_v5 = vpop.f32.mrf.mxu1 }
 0x778   :  { %5567 = vtanh.f32 %v4314_v2  ;;  %v4316_v6 = vadd.f32 %v4315_v4, %v2942_v62  ;;  %v4357_v7 = vadd.f32 %v4356_v5, %v2950_v63 }
 0x779   :  { %5569 = vtanh.f32 %v4355_v3  ;;  %v4317_v8 = vpop.f32.mrf.mxu0  ;;  %v4358_v9 = vpop.f32.mrf.mxu1 }
 0x77a   :  { %5571 = vtanh.f32 %v4316_v6 }
 0x77b   :  { %5573 = vtanh.f32 %v4357_v7  ;;  %v4318_v25 = vpop.f32.mrf.mxu0  ;;  %v4359_v27 = vpop.f32.mrf.mxu1 }
 0x785   :  { %v5568_v61 = vpop.eup %5567 }
 0x786   :  { %v5570_v29 = vpop.eup %5569  ;;  %4483 = vst [vmem:[%s7320_s17 + $0x80] sm:$0xff] %v5568_v61 }
 0x787   :  { %v5572_v30 = vpop.eup %5571  ;;  %4485 = vst [vmem:[%s7320_s17 + $0x90] sm:$0xff] %v5570_v29 }
 0x788   :  { %v5574_v10 = vpop.eup %5573  ;;  %4484 = vst [vmem:[%s7320_s17 + $0x88] sm:$0xff] %v5572_v30 }
 0x789   :  { %4486 = vst [vmem:[%s7320_s17 + $0x98] sm:$0xff] %v5574_v10 }
 0x795   :  { %v4395_v16 = vpop.f32.mrf.mxu0  ;;  %v4436_v17 = vpop.f32.mrf.mxu1 }
 0x796   :  { %v4396_v18 = vadd.f32 %v4395_v16, %v2954_v11  ;;  %v4437_v19 = vadd.f32 %v4436_v17, %v2962_v12 }
 0x797   :  { %v4397_v20 = vpop.f32.mrf.mxu0  ;;  %v4438_v21 = vpop.f32.mrf.mxu1 }
 0x798   :  { %5575 = vtanh.f32 %v4396_v18  ;;  %v4398_v22 = vadd.f32 %v4397_v20, %v2958_v13  ;;  %v4439_v23 = vadd.f32 %v4438_v21, %v2966_v15 }
 0x799   :  { %5577 = vtanh.f32 %v4437_v19  ;;  %v4399_v24 = vpop.f32.mrf.mxu0  ;;  %v4440_v28 = vpop.f32.mrf.mxu1 }
 0x79a   :  { %5579 = vtanh.f32 %v4398_v22 }
 0x79b   :  { %5581 = vtanh.f32 %v4439_v23  ;;  %v4400_v50 = vpop.f32.mrf.mxu0  ;;  %v4441_v51 = vpop.f32.mrf.mxu1 }
 0x7a5   :  { %v5576_v31 = vpop.eup %5575 }
 0x7a6   :  { %v5578_v52 = vpop.eup %5577  ;;  %4487 = vst [vmem:[%s7320_s17 + $0xa0] sm:$0xff] %v5576_v31 }
 0x7a7   :  { %v5580_v53 = vpop.eup %5579  ;;  %4489 = vst [vmem:[%s7320_s17 + $0xb0] sm:$0xff] %v5578_v52 }
 0x7a8   :  { %v5582_v32 = vpop.eup %5581  ;;  %4488 = vst [vmem:[%s7320_s17 + $0xa8] sm:$0xff] %v5580_v53 }
 0x7a9   :  { %4490 = vst [vmem:[%s7320_s17 + $0xb8] sm:$0xff] %v5582_v32 }

</bundles_post_ra>
